<compile_context>
chip_gen: v7x
topology: tpu7x:2x2x1
jax: 0.10.0
libtpu: 0.0.40
codegen_flags: <defaults>
</compile_context>

<pallas_src>
import math

import jax
import jax.numpy as jnp
from jax.experimental import pallas as pl
from jax.experimental.pallas import tpu as pltpu


# ------------------------------------------------------------------ helpers
def _gelu(x):
    # PyTorch nn.GELU() default = exact (erf-based) GELU.
    return 0.5 * x * (1.0 + jax.lax.erf(x * (1.0 / math.sqrt(2.0))))


def _vmem_limit_bytes():
    # Raise the scoped VMEM limit (defaults are only 16/32 MiB) but leave
    # headroom on v7x (64 MiB physical).
    try:
        info = pltpu.get_tpu_info()
        phys = int(getattr(info, "vmem_capacity_bytes", 128 * 1024 * 1024))
    except Exception:
        phys = 128 * 1024 * 1024
    return int(min(100 * 1024 * 1024, phys * 3 // 4))


def _default_node_tile(n, cap=512):
    """Largest node tile <= cap dividing N (multiple of 8 preferred); else full N."""
    if n <= cap:
        return n
    for t in range(cap - cap % 8, 7, -8):
        if n % t == 0:
            return t
    return n


# ------------------------------------------------- kernel 1: reduce over nodes
def _ada_hg_reduce_kernel(x_ref, m_ref, c_ref, we_ref, be_ref, wn_ref,
                          ts_ref, mx_ref, m_sc, d_sc, num_sc):
    t = pl.program_id(1)
    nt = pl.num_programs(1)

    @pl.when(t == 0)
    def _():
        m_sc[...] = jnp.full_like(m_sc, -jnp.inf)
        d_sc[...] = jnp.zeros_like(d_sc)
        num_sc[...] = jnp.zeros_like(num_sc)

    x = x_ref[0]                                    # (TN, D)  bf16
    m = m_ref[0]                                    # (L, D)   bf16 (folded & scaled)
    c = c_ref[0]                                    # (L, 1)   f32  (folded & scaled)

    # logits^T (L, TN) = M @ X_tile^T + c   (pre_head_proj + head-mean fold, exact)
    lg = jax.lax.dot_general(m, x, (((1,), (1,)), ((), ())),
                             preferred_element_type=jnp.float32) + c

    # online softmax statistics over nodes (lane reduce) + numerator A^T X.
    m_prev = m_sc[...]                              # (L, 1)
    m_new = jnp.maximum(m_prev, jnp.max(lg, axis=1, keepdims=True))
    alpha = jnp.exp(m_prev - m_new)                 # (L, 1)
    p = jnp.exp(lg - m_new)                         # (L, TN) f32
    d_sc[...] = alpha * d_sc[...] + jnp.sum(p, axis=1, keepdims=True)
    num_sc[...] = alpha * num_sc[...] + jax.lax.dot_general(
        p.astype(x.dtype), x, (((1,), (0,)), ((), ())),
        preferred_element_type=jnp.float32)         # (L, D)
    m_sc[...] = m_new

    @pl.when(t == nt - 1)
    def _():
        inv_d = 1.0 / d_sc[...]                     # exact divide, tiny (L,1)
        he = num_sc[...] * inv_d                    # He = A^T X      (L, D)
        # edge_proj: GELU(He @ W_e^T + b_e)
        he = _gelu(jax.lax.dot_general(
            he.astype(we_ref.dtype), we_ref[...], (((1,), (1,)), ((), ())),
            preferred_element_type=jnp.float32) + be_ref[...])
        # reassociated node_proj weight: T = He' @ W_n^T (bias added in kernel 2)
        tmat = jax.lax.dot_general(
            he.astype(wn_ref.dtype), wn_ref[...], (((1,), (1,)), ((), ())),
            preferred_element_type=jnp.float32)     # (L, D)
        ts_ref[0] = (tmat * inv_d).astype(ts_ref.dtype)   # fold 1/denom of A
        mx_ref[0] = m_sc[...]                       # per-hyperedge max (L, 1)


# ------------------------------------------------- kernel 2: apply per node tile
def _ada_hg_apply_kernel(x_ref, m_ref, b2_ref, ts_ref, bn_ref, o_ref):
    x = x_ref[0]                                    # (TN, D) bf16
    # logits (TN, L) = X_tile @ M^T ;  b2 = c - m_final  (softmax max folded)
    lg = jax.lax.dot_general(x, m_ref[0], (((1,), (1,)), ((), ())),
                             preferred_element_type=jnp.float32)
    p = jnp.exp(lg + b2_ref[0])                     # unnormalised A tile (TN, L)
    # X_new tile = A_tile @ T_scaled   (normalisation + W_n already folded in)
    xn = jax.lax.dot_general(p.astype(ts_ref.dtype), ts_ref[0],
                             (((1,), (0,)), ((), ())),
                             preferred_element_type=jnp.float32)   # (TN, D)
    xn = _gelu(xn + bn_ref[...])                    # node_proj bias + GELU
    o_ref[0] = (xn + x.astype(jnp.float32)).astype(o_ref.dtype)    # residual


# ----------------------------------------------------------------- wrapper
def ada_hg_conv(X, params, num_heads, *, node_tile=None,
                compute_dtype=jnp.bfloat16):
    """AdaHGConv forward. X: (B, N, D) -> (B, N, D). Weights in torch (out, in) layout."""
    B, N, D = X.shape
    L = params["proto_base"].shape[0]
    head_dim = D // num_heads
    inv_scale = 1.0 / (num_heads * math.sqrt(head_dim))

    TN = _default_node_tile(N) if node_tile is None else int(node_tile)
    assert N % TN == 0, f"node_tile {TN} must divide N={N}"
    NT = N // TN

    # --- AdaHyperedgeGen context path (context='both'), tiny, plain JAX -------
    avg = jnp.mean(X, axis=1)                                   # (B, D)
    mx = jnp.max(X, axis=1)                                     # (B, D)
    ctx = jnp.concatenate([avg, mx], axis=-1)                   # (B, 2D)
    offsets = ctx @ params["w_ctx"].T + params["b_ctx"]         # (B, L*D)
    protos = params["proto_base"][None] + offsets.reshape(B, L, D)

    # --- fold pre_head_proj + head-mean scaling into the prototypes (exact) ---
    M = jnp.einsum("blo,oi->bli", protos, params["w_pre"]) * inv_scale      # (B, L, D)
    c = (protos @ params["b_pre"]) * inv_scale                              # (B, L)

    cd = compute_dtype
    Xc = X.astype(cd)
    Mc = M.astype(cd)
    We = params["w_edge"].astype(cd)
    Wn = params["w_node"].astype(cd)
    be = params["b_edge"].reshape(1, D).astype(jnp.float32)
    bn = params["b_node"].reshape(1, D).astype(jnp.float32)
    c_col = c[..., None].astype(jnp.float32)                    # (B, L, 1)

    vmem = _vmem_limit_bytes()

    # ---- pass 1: reduce over nodes -> T_scaled (B,L,D), per-edge max (B,L,1) --
    ts, m_fin = pl.pallas_call(
        _ada_hg_reduce_kernel,
        out_shape=(jax.ShapeDtypeStruct((B, L, D), cd),
                   jax.ShapeDtypeStruct((B, L, 1), jnp.float32)),
        grid_spec=pltpu.PrefetchScalarGridSpec(
            num_scalar_prefetch=0,
            grid=(B, NT),
            in_specs=[
                pl.BlockSpec((1, TN, D), lambda b, t: (b, t, 0)),   # X tile
                pl.BlockSpec((1, L, D), lambda b, t: (b, 0, 0)),    # folded M
                pl.BlockSpec((1, L, 1), lambda b, t: (b, 0, 0)),    # folded c
                pl.BlockSpec((D, D), lambda b, t: (0, 0)),          # edge_proj W
                pl.BlockSpec((1, D), lambda b, t: (0, 0)),          # edge_proj b
                pl.BlockSpec((D, D), lambda b, t: (0, 0)),          # node_proj W
            ],
            out_specs=[
                pl.BlockSpec((1, L, D), lambda b, t: (b, 0, 0)),    # T_scaled
                pl.BlockSpec((1, L, 1), lambda b, t: (b, 0, 0)),    # m_final
            ],
            scratch_shapes=[
                pltpu.VMEM((L, 1), jnp.float32),    # running max
                pltpu.VMEM((L, 1), jnp.float32),    # running denom
                pltpu.VMEM((L, D), jnp.float32),    # running numerator A^T X
            ],
        ),
        compiler_params=pltpu.CompilerParams(
            dimension_semantics=("parallel", "arbitrary"),
            vmem_limit_bytes=vmem),
    )(Xc, Mc, c_col, We, be, Wn)

    # tiny (B, 1, L) bias with the softmax max folded in:  b2 = c - m_final
    bias2 = jnp.swapaxes(c_col - m_fin, 1, 2)                   # (B, 1, L)

    # ---- pass 2: per-tile apply (logits -> A tile -> X_new -> GELU -> +X) ----
    out = pl.pallas_call(
        _ada_hg_apply_kernel,
        out_shape=jax.ShapeDtypeStruct((B, N, D), X.dtype),
        grid_spec=pltpu.PrefetchScalarGridSpec(
            num_scalar_prefetch=0,
            grid=(B, NT),
            in_specs=[
                pl.BlockSpec((1, TN, D), lambda b, t: (b, t, 0)),   # X tile
                pl.BlockSpec((1, L, D), lambda b, t: (b, 0, 0)),    # folded M
                pl.BlockSpec((1, 1, L), lambda b, t: (b, 0, 0)),    # c - m_final
                pl.BlockSpec((1, L, D), lambda b, t: (b, 0, 0)),    # T_scaled
                pl.BlockSpec((1, D), lambda b, t: (0, 0)),          # node_proj b
            ],
            out_specs=pl.BlockSpec((1, TN, D), lambda b, t: (b, t, 0)),
        ),
        compiler_params=pltpu.CompilerParams(
            dimension_semantics=("parallel", "parallel"),
            vmem_limit_bytes=vmem),
    )(Xc, Mc, bias2, ts, bn)

    return out


# --------------------------------------------------------- pure-JAX reference
def ada_hg_conv_reference(X, params, num_heads):
    """Faithful re-implementation of the PyTorch module (per-head logits, eval mode)."""
    B, N, D = X.shape
    L = params["proto_base"].shape[0]
    hd = D // num_heads

    avg = jnp.mean(X, axis=1)
    mx = jnp.max(X, axis=1)
    ctx = jnp.concatenate([avg, mx], axis=-1)
    offsets = ctx @ params["w_ctx"].T + params["b_ctx"]
    protos = params["proto_base"][None] + offsets.reshape(B, L, D)

    xproj = X @ params["w_pre"].T + params["b_pre"]
    xh = xproj.reshape(B, N, num_heads, hd).transpose(0, 2, 1, 3)      # (B,H,N,hd)
    ph = protos.reshape(B, L, num_heads, hd).transpose(0, 2, 1, 3)     # (B,H,L,hd)
    logits = jnp.einsum("bhnd,bhld->bhnl", xh, ph) / math.sqrt(hd)
    logits = jnp.mean(logits, axis=1)                                  # (B, N, L)
    A = jax.nn.softmax(logits, axis=1)                                 # softmax over nodes

    He = jnp.einsum("bnl,bnd->bld", A, X)
    He = _gelu(He @ params["w_edge"].T + params["b_edge"])
    Xn = jnp.einsum("bnl,bld->bnd", A, He)
    Xn = _gelu(Xn @ params["w_node"].T + params["b_node"])
    return Xn + X


# ----------------------------------------------------------- deterministic init
def init_params(key, D, L):
    ks = jax.random.split(key, 6)
    f32 = jnp.float32

    def linear(k, fan_in, fan_out):
        kw, kb = jax.random.split(k)
        w = jax.random.normal(kw, (fan_out, fan_in), f32) * (1.0 / math.sqrt(fan_in))
        b = 0.05 * jax.random.normal(kb, (fan_out,), f32)
        return w, b

    p = {}
    p["proto_base"] = jax.random.normal(ks[0], (L, D), f32) * (1.0 / math.sqrt(D))
    p["w_ctx"], p["b_ctx"] = linear(ks[1], 2 * D, L * D)
    p["w_pre"], p["b_pre"] = linear(ks[2], D, D)
    p["w_edge"], p["b_edge"] = linear(ks[3], D, D)
    p["w_node"], p["b_node"] = linear(ks[4], D, D)
    return p


if __name__ == "__main__":
    key = jax.random.PRNGKey(0)
    kx, kp = jax.random.split(key)

    # small AdaHGConv config (matches the module docstring scale):
    B, N, D = 2, 256, 64          # batch, nodes, embed_dim
    L, num_heads = 16, 4          # num_hyperedges, heads

    x = jax.random.normal(kx, (B, N, D), jnp.float32)
    params = init_params(kp, D, L)

    # node_tile=128 -> 2 node tiles per batch: exercises the online-softmax path.
    fwd = jax.jit(lambda xx, pp: ada_hg_conv(xx, pp, num_heads, node_tile=128))
    out = jax.block_until_ready(fwd(x, params))
    assert out.shape == (B, N, D), out.shape
    assert jnp.isfinite(out).all()

    ref = jax.block_until_ready(ada_hg_conv_reference(x, params, num_heads))
    rel_err = jnp.max(jnp.abs(out - ref)) / (jnp.max(jnp.abs(ref)) + 1e-6)
    assert rel_err < 5e-2, f"mismatch vs reference (tiled): rel_err={rel_err}"

    # also exercise the single-tile (NT=1) path with the default tile chooser.
    fwd1 = jax.jit(lambda xx, pp: ada_hg_conv(xx, pp, num_heads))
    out1 = jax.block_until_ready(fwd1(x, params))
    rel_err1 = jnp.max(jnp.abs(out1 - ref)) / (jnp.max(jnp.abs(ref)) + 1e-6)
    assert rel_err1 < 5e-2, f"mismatch vs reference (full-N): rel_err={rel_err1}"

    print("KERNEL_OK")
</pallas_src>

<mosaic_0001>
module attributes {stable_mosaic.version = 11 : i64} {
  func.func @_ada_hg_apply_kernel(%arg0: i32, %arg1: i32, %arg2: memref<1x128x64xbf16, #tpu.memory_space<vmem>>, %arg3: memref<1x16x64xbf16, #tpu.memory_space<vmem>>, %arg4: memref<1x1x16xf32, #tpu.memory_space<vmem>>, %arg5: memref<1x16x64xbf16, #tpu.memory_space<vmem>>, %arg6: memref<1x64xf32, #tpu.memory_space<vmem>>, %arg7: memref<1x128x64xf32, #tpu.memory_space<vmem>>) attributes {dimension_semantics = [#tpu.dimension_semantics<parallel>, #tpu.dimension_semantics<parallel>], iteration_bounds = array<i64: 2, 2>, scalar_prefetch = 0 : i64, scratch_operands = 0 : i64, tpu.core_type = #tpu.core_type<tc>, window_params = [{transform_indices = @transform_0, window_bounds = array<i64: 1, 128, 64>}, {transform_indices = @transform_1, window_bounds = array<i64: 1, 16, 64>}, {transform_indices = @transform_2, window_bounds = array<i64: 1, 1, 16>}, {transform_indices = @transform_3, window_bounds = array<i64: 1, 16, 64>}, {pipeline_mode = #tpu.pipeline_mode<synchronous>, transform_indices = @transform_4, window_bounds = array<i64: 1, 64>}, {transform_indices = @transform_5, window_bounds = array<i64: 1, 128, 64>}]} {
    %c0 = arith.constant 0 : index
    %c0_0 = arith.constant 0 : index
    %c0_1 = arith.constant 0 : index
    %0 = vector.load %arg2[%c0, %c0_0, %c0_1] : memref<1x128x64xbf16, #tpu.memory_space<vmem>>, vector<1x128x64xbf16>
    %1 = vector.shape_cast %0 : vector<1x128x64xbf16> to vector<128x64xbf16>
    %c0_2 = arith.constant 0 : index
    %c0_3 = arith.constant 0 : index
    %c0_4 = arith.constant 0 : index
    %2 = vector.load %arg3[%c0_2, %c0_3, %c0_4] : memref<1x16x64xbf16, #tpu.memory_space<vmem>>, vector<1x16x64xbf16>
    %3 = vector.shape_cast %2 : vector<1x16x64xbf16> to vector<16x64xbf16>
    %cst = arith.constant dense<0.000000e+00> : vector<128x16xf32>
    %4 = tpu.matmul %1, %3, %cst {dimension_numbers = #tpu.dot_dimension_numbers<[1], [1], [0], [0], [0, 0, 1, 0], [], []>} : vector<128x64xbf16>, vector<16x64xbf16>, vector<128x16xf32> -> vector<128x16xf32>
    %c0_5 = arith.constant 0 : index
    %c0_6 = arith.constant 0 : index
    %c0_7 = arith.constant 0 : index
    %5 = vector.load %arg4[%c0_5, %c0_6, %c0_7] : memref<1x1x16xf32, #tpu.memory_space<vmem>>, vector<1x1x16xf32>
    %6 = vector.shape_cast %5 : vector<1x1x16xf32> to vector<1x16xf32>
    %7 = vector.broadcast %6 : vector<1x16xf32> to vector<128x16xf32>
    %8 = arith.addf %4, %7 : vector<128x16xf32>
    %9 = math.exp %8 : vector<128x16xf32>
    %10 = arith.truncf %9 : vector<128x16xf32> to vector<128x16xbf16>
    %c0_8 = arith.constant 0 : index
    %c0_9 = arith.constant 0 : index
    %c0_10 = arith.constant 0 : index
    %11 = vector.load %arg5[%c0_8, %c0_9, %c0_10] : memref<1x16x64xbf16, #tpu.memory_space<vmem>>, vector<1x16x64xbf16>
    %12 = vector.shape_cast %11 : vector<1x16x64xbf16> to vector<16x64xbf16>
    %cst_11 = arith.constant dense<0.000000e+00> : vector<128x64xf32>
    %13 = tpu.matmul %10, %12, %cst_11 {dimension_numbers = #tpu.dot_dimension_numbers<[1], [0], [0], [1], [0, 0, 1, 1], [], []>} : vector<128x16xbf16>, vector<16x64xbf16>, vector<128x64xf32> -> vector<128x64xf32>
    %c0_12 = arith.constant 0 : index
    %c0_13 = arith.constant 0 : index
    %14 = vector.load %arg6[%c0_12, %c0_13] : memref<1x64xf32, #tpu.memory_space<vmem>>, vector<1x64xf32>
    %15 = vector.broadcast %14 : vector<1x64xf32> to vector<128x64xf32>
    %16 = arith.addf %13, %15 : vector<128x64xf32>
    %cst_14 = arith.constant 5.000000e-01 : f32
    %17 = vector.broadcast %cst_14 : f32 to vector<128x64xf32>
    %18 = arith.mulf %17, %16 : vector<128x64xf32>
    %cst_15 = arith.constant 0.707106769 : f32
    %19 = vector.broadcast %cst_15 : f32 to vector<128x64xf32>
    %20 = arith.mulf %16, %19 : vector<128x64xf32>
    %21 = math.erf %20 : vector<128x64xf32>
    %cst_16 = arith.constant 1.000000e+00 : f32
    %22 = vector.broadcast %cst_16 : f32 to vector<128x64xf32>
    %23 = arith.addf %22, %21 : vector<128x64xf32>
    %24 = arith.mulf %18, %23 : vector<128x64xf32>
    %25 = arith.extf %1 : vector<128x64xbf16> to vector<128x64xf32>
    %26 = arith.addf %24, %25 : vector<128x64xf32>
    %c0_17 = arith.constant 0 : index
    %c0_18 = arith.constant 0 : index
    %c0_19 = arith.constant 0 : index
    %27 = vector.load %arg7[%c0_17, %c0_18, %c0_19] : memref<1x128x64xf32, #tpu.memory_space<vmem>>, vector<1x128x64xf32>
    %28 = vector.shape_cast %27 : vector<1x128x64xf32> to vector<128x64xf32>
    %29 = vector.shape_cast %26 : vector<128x64xf32> to vector<1x128x64xf32>
    tpu.vector_store %arg7[%c0_17, %c0_18, %c0_19], %29 {strides = array<i32>} : memref<1x128x64xf32, #tpu.memory_space<vmem>>, vector<1x128x64xf32>,
    return
  }
  func.func @transform_0(%arg0: i32, %arg1: i32) -> (i32, i32, i32) {
    %c0_i32 = arith.constant 0 : i32
    %c0_i32_0 = arith.constant 0 : i32
    return %arg0, %arg1, %c0_i32 : i32, i32, i32
  }
  func.func @transform_1(%arg0: i32, %arg1: i32) -> (i32, i32, i32) {
    %c0_i32 = arith.constant 0 : i32
    %c0_i32_0 = arith.constant 0 : i32
    %c0_i32_1 = arith.constant 0 : i32
    return %arg0, %c0_i32, %c0_i32_0 : i32, i32, i32
  }
  func.func @transform_2(%arg0: i32, %arg1: i32) -> (i32, i32, i32) {
    %c0_i32 = arith.constant 0 : i32
    %c0_i32_0 = arith.constant 0 : i32
    %c0_i32_1 = arith.constant 0 : i32
    return %arg0, %c0_i32, %c0_i32_0 : i32, i32, i32
  }
  func.func @transform_3(%arg0: i32, %arg1: i32) -> (i32, i32, i32) {
    %c0_i32 = arith.constant 0 : i32
    %c0_i32_0 = arith.constant 0 : i32
    %c0_i32_1 = arith.constant 0 : i32
    return %arg0, %c0_i32, %c0_i32_0 : i32, i32, i32
  }
  func.func @transform_4(%arg0: i32, %arg1: i32) -> (i32, i32) {
    %c0_i32 = arith.constant 0 : i32
    %c0_i32_0 = arith.constant 0 : i32
    %c0_i32_1 = arith.constant 0 : i32
    return %c0_i32, %c0_i32_0 : i32, i32
  }
  func.func @transform_5(%arg0: i32, %arg1: i32) -> (i32, i32, i32) {
    %c0_i32 = arith.constant 0 : i32
    %c0_i32_0 = arith.constant 0 : i32
    return %arg0, %arg1, %c0_i32 : i32, i32, i32
  }
}

module attributes {stable_mosaic.version = 11 : i64} {
  func.func @_ada_hg_reduce_kernel(%arg0: i32, %arg1: i32, %arg2: memref<1x128x64xbf16, #tpu.memory_space<vmem>>, %arg3: memref<1x16x64xbf16, #tpu.memory_space<vmem>>, %arg4: memref<1x16x1xf32, #tpu.memory_space<vmem>>, %arg5: memref<64x64xbf16, #tpu.memory_space<vmem>>, %arg6: memref<1x64xf32, #tpu.memory_space<vmem>>, %arg7: memref<64x64xbf16, #tpu.memory_space<vmem>>, %arg8: memref<1x16x64xbf16, #tpu.memory_space<vmem>>, %arg9: memref<1x16x1xf32, #tpu.memory_space<vmem>>, %arg10: memref<16x1xf32, #tpu.memory_space<vmem>>, %arg11: memref<16x1xf32, #tpu.memory_space<vmem>>, %arg12: memref<16x64xf32, #tpu.memory_space<vmem>>) attributes {dimension_semantics = [#tpu.dimension_semantics<parallel>, #tpu.dimension_semantics<arbitrary>], iteration_bounds = array<i64: 2, 2>, scalar_prefetch = 0 : i64, scratch_operands = 3 : i64, tpu.core_type = #tpu.core_type<tc>, window_params = [{transform_indices = @transform_0, window_bounds = array<i64: 1, 128, 64>}, {transform_indices = @transform_1, window_bounds = array<i64: 1, 16, 64>}, {transform_indices = @transform_2, window_bounds = array<i64: 1, 16, 1>}, {pipeline_mode = #tpu.pipeline_mode<synchronous>, transform_indices = @transform_3, window_bounds = array<i64: 64, 64>}, {pipeline_mode = #tpu.pipeline_mode<synchronous>, transform_indices = @transform_4, window_bounds = array<i64: 1, 64>}, {pipeline_mode = #tpu.pipeline_mode<synchronous>, transform_indices = @transform_5, window_bounds = array<i64: 64, 64>}, {transform_indices = @transform_6, window_bounds = array<i64: 1, 16, 64>}, {transform_indices = @transform_7, window_bounds = array<i64: 1, 16, 1>}]} {
    %c0_i32 = arith.constant 0 : i32
    %0 = arith.cmpi eq, %arg1, %c0_i32 : i32
    %1 = arith.extui %0 : i1 to i32
    %c0_i32_0 = arith.constant 0 : i32
    %2 = arith.cmpi ne, %1, %c0_i32_0 : i32
    scf.if %2 {
      %cst_25 = arith.constant 0xFF800000 : f32
      %38 = vector.broadcast %cst_25 : f32 to vector<16x1xf32>
      %c0_26 = arith.constant 0 : index
      %c0_27 = arith.constant 0 : index
      %39 = vector.load %arg10[%c0_26, %c0_27] : memref<16x1xf32, #tpu.memory_space<vmem>>, vector<16x1xf32>
      tpu.vector_store %arg10[%c0_26, %c0_27], %38 {strides = array<i32>} : memref<16x1xf32, #tpu.memory_space<vmem>>, vector<16x1xf32>,
      %cst_28 = arith.constant 0.000000e+00 : f32
      %40 = vector.broadcast %cst_28 : f32 to vector<16x1xf32>
      %c0_29 = arith.constant 0 : index
      %c0_30 = arith.constant 0 : index
      %41 = vector.load %arg11[%c0_29, %c0_30] : memref<16x1xf32, #tpu.memory_space<vmem>>, vector<16x1xf32>
      tpu.vector_store %arg11[%c0_29, %c0_30], %40 {strides = array<i32>} : memref<16x1xf32, #tpu.memory_space<vmem>>, vector<16x1xf32>,
      %cst_31 = arith.constant 0.000000e+00 : f32
      %42 = vector.broadcast %cst_31 : f32 to vector<16x64xf32>
      %c0_32 = arith.constant 0 : index
      %c0_33 = arith.constant 0 : index
      %43 = vector.load %arg12[%c0_32, %c0_33] : memref<16x64xf32, #tpu.memory_space<vmem>>, vector<16x64xf32>
      tpu.vector_store %arg12[%c0_32, %c0_33], %42 {strides = array<i32>} : memref<16x64xf32, #tpu.memory_space<vmem>>, vector<16x64xf32>,
    } else {
    }
    %c0 = arith.constant 0 : index
    %c0_1 = arith.constant 0 : index
    %c0_2 = arith.constant 0 : index
    %3 = vector.load %arg2[%c0, %c0_1, %c0_2] : memref<1x128x64xbf16, #tpu.memory_space<vmem>>, vector<1x128x64xbf16>
    %4 = vector.shape_cast %3 : vector<1x128x64xbf16> to vector<128x64xbf16>
    %c0_3 = arith.constant 0 : index
    %c0_4 = arith.constant 0 : index
    %c0_5 = arith.constant 0 : index
    %5 = vector.load %arg3[%c0_3, %c0_4, %c0_5] : memref<1x16x64xbf16, #tpu.memory_space<vmem>>, vector<1x16x64xbf16>
    %6 = vector.shape_cast %5 : vector<1x16x64xbf16> to vector<16x64xbf16>
    %c0_6 = arith.constant 0 : index
    %c0_7 = arith.constant 0 : index
    %c0_8 = arith.constant 0 : index
    %7 = vector.load %arg4[%c0_6, %c0_7, %c0_8] : memref<1x16x1xf32, #tpu.memory_space<vmem>>, vector<1x16x1xf32>
    %8 = vector.shape_cast %7 : vector<1x16x1xf32> to vector<16x1xf32>
    %cst = arith.constant dense<0.000000e+00> : vector<16x128xf32>
    %9 = tpu.matmul %6, %4, %cst {dimension_numbers = #tpu.dot_dimension_numbers<[1], [1], [0], [0], [0, 0, 1, 0], [], []>} : vector<16x64xbf16>, vector<128x64xbf16>, vector<16x128xf32> -> vector<16x128xf32>
    %10 = vector.broadcast %8 : vector<16x1xf32> to vector<16x128xf32>
    %11 = arith.addf %9, %10 : vector<16x128xf32>
    %c0_9 = arith.constant 0 : index
    %c0_10 = arith.constant 0 : index
    %12 = vector.load %arg10[%c0_9, %c0_10] : memref<16x1xf32, #tpu.memory_space<vmem>>, vector<16x1xf32>
    %cst_11 = arith.constant dense<0xFF800000> : vector<16xf32>
    %13 = vector.multi_reduction <maximumf>, %11, %cst_11 [1] : vector<16x128xf32> to vector<16xf32>
    %14 = vector.shape_cast %13 : vector<16xf32> to vector<16x1xf32>
    %15 = arith.maximumf %12, %14 : vector<16x1xf32>
    %16 = arith.subf %12, %15 : vector<16x1xf32>
    %17 = math.exp %16 : vector<16x1xf32>
    %18 = vector.broadcast %15 : vector<16x1xf32> to vector<16x128xf32>
    %19 = arith.subf %11, %18 : vector<16x128xf32>
    %20 = math.exp %19 : vector<16x128xf32>
    %c0_12 = arith.constant 0 : index
    %c0_13 = arith.constant 0 : index
    %21 = vector.load %arg11[%c0_12, %c0_13] : memref<16x1xf32, #tpu.memory_space<vmem>>, vector<16x1xf32>
    %22 = arith.mulf %17, %21 : vector<16x1xf32>
    %cst_14 = arith.constant dense<0.000000e+00> : vector<16xf32>
    %23 = vector.multi_reduction <add>, %20, %cst_14 [1] : vector<16x128xf32> to vector<16xf32>
    %24 = vector.shape_cast %23 : vector<16xf32> to vector<16x1xf32>
    %25 = arith.addf %22, %24 : vector<16x1xf32>
    %c0_15 = arith.constant 0 : index
    %c0_16 = arith.constant 0 : index
    %26 = vector.load %arg11[%c0_15, %c0_16] : memref<16x1xf32, #tpu.memory_space<vmem>>, vector<16x1xf32>
    tpu.vector_store %arg11[%c0_15, %c0_16], %25 {strides = array<i32>} : memref<16x1xf32, #tpu.memory_space<vmem>>, vector<16x1xf32>,
    %c0_17 = arith.constant 0 : index
    %c0_18 = arith.constant 0 : index
    %27 = vector.load %arg12[%c0_17, %c0_18] : memref<16x64xf32, #tpu.memory_space<vmem>>, vector<16x64xf32>
    %28 = vector.broadcast %17 : vector<16x1xf32> to vector<16x64xf32>
    %29 = arith.mulf %28, %27 : vector<16x64xf32>
    %30 = arith.truncf %20 : vector<16x128xf32> to vector<16x128xbf16>
    %cst_19 = arith.constant dense<0.000000e+00> : vector<16x64xf32>
    %31 = tpu.matmul %30, %4, %cst_19 {dimension_numbers = #tpu.dot_dimension_numbers<[1], [0], [0], [1], [0, 0, 1, 1], [], []>} : vector<16x128xbf16>, vector<128x64xbf16>, vector<16x64xf32> -> vector<16x64xf32>
    %32 = arith.addf %29, %31 : vector<16x64xf32>
    %c0_20 = arith.constant 0 : index
    %c0_21 = arith.constant 0 : index
    %33 = vector.load %arg12[%c0_20, %c0_21] : memref<16x64xf32, #tpu.memory_space<vmem>>, vector<16x64xf32>
    tpu.vector_store %arg12[%c0_20, %c0_21], %32 {strides = array<i32>} : memref<16x64xf32, #tpu.memory_space<vmem>>, vector<16x64xf32>,
    %c0_22 = arith.constant 0 : index
    %c0_23 = arith.constant 0 : index
    %34 = vector.load %arg10[%c0_22, %c0_23] : memref<16x1xf32, #tpu.memory_space<vmem>>, vector<16x1xf32>
    tpu.vector_store %arg10[%c0_22, %c0_23], %15 {strides = array<i32>} : memref<16x1xf32, #tpu.memory_space<vmem>>, vector<16x1xf32>,
    %c1_i32 = arith.constant 1 : i32
    %35 = arith.cmpi eq, %arg1, %c1_i32 : i32
    %36 = arith.extui %35 : i1 to i32
    %c0_i32_24 = arith.constant 0 : i32
    %37 = arith.cmpi ne, %36, %c0_i32_24 : i32
    scf.if %37 {
      %c0_25 = arith.constant 0 : index
      %c0_26 = arith.constant 0 : index
      %38 = vector.load %arg11[%c0_25, %c0_26] : memref<16x1xf32, #tpu.memory_space<vmem>>, vector<16x1xf32>
      %cst_27 = arith.constant 1.000000e+00 : f32
      %39 = vector.broadcast %cst_27 : f32 to vector<16x1xf32>
      %40 = arith.divf %39, %38 : vector<16x1xf32>
      %c0_28 = arith.constant 0 : index
      %c0_29 = arith.constant 0 : index
      %41 = vector.load %arg12[%c0_28, %c0_29] : memref<16x64xf32, #tpu.memory_space<vmem>>, vector<16x64xf32>
      %42 = vector.broadcast %40 : vector<16x1xf32> to vector<16x64xf32>
      %43 = arith.mulf %41, %42 : vector<16x64xf32>
      %44 = arith.truncf %43 : vector<16x64xf32> to vector<16x64xbf16>
      %c0_30 = arith.constant 0 : index
      %c0_31 = arith.constant 0 : index
      %45 = vector.load %arg5[%c0_30, %c0_31] : memref<64x64xbf16, #tpu.memory_space<vmem>>, vector<64x64xbf16>
      %cst_32 = arith.constant dense<0.000000e+00> : vector<16x64xf32>
      %46 = tpu.matmul %44, %45, %cst_32 {dimension_numbers = #tpu.dot_dimension_numbers<[1], [1], [0], [0], [0, 0, 1, 0], [], []>} : vector<16x64xbf16>, vector<64x64xbf16>, vector<16x64xf32> -> vector<16x64xf32>
      %c0_33 = arith.constant 0 : index
      %c0_34 = arith.constant 0 : index
      %47 = vector.load %arg6[%c0_33, %c0_34] : memref<1x64xf32, #tpu.memory_space<vmem>>, vector<1x64xf32>
      %48 = vector.broadcast %47 : vector<1x64xf32> to vector<16x64xf32>
      %49 = arith.addf %46, %48 : vector<16x64xf32>
      %cst_35 = arith.constant 5.000000e-01 : f32
      %50 = vector.broadcast %cst_35 : f32 to vector<16x64xf32>
      %51 = arith.mulf %50, %49 : vector<16x64xf32>
      %cst_36 = arith.constant 0.707106769 : f32
      %52 = vector.broadcast %cst_36 : f32 to vector<16x64xf32>
      %53 = arith.mulf %49, %52 : vector<16x64xf32>
      %54 = math.erf %53 : vector<16x64xf32>
      %cst_37 = arith.constant 1.000000e+00 : f32
      %55 = vector.broadcast %cst_37 : f32 to vector<16x64xf32>
      %56 = arith.addf %55, %54 : vector<16x64xf32>
      %57 = arith.mulf %51, %56 : vector<16x64xf32>
      %58 = arith.truncf %57 : vector<16x64xf32> to vector<16x64xbf16>
      %c0_38 = arith.constant 0 : index
      %c0_39 = arith.constant 0 : index
      %59 = vector.load %arg7[%c0_38, %c0_39] : memref<64x64xbf16, #tpu.memory_space<vmem>>, vector<64x64xbf16>
      %cst_40 = arith.constant dense<0.000000e+00> : vector<16x64xf32>
      %60 = tpu.matmul %58, %59, %cst_40 {dimension_numbers = #tpu.dot_dimension_numbers<[1], [1], [0], [0], [0, 0, 1, 0], [], []>} : vector<16x64xbf16>, vector<64x64xbf16>, vector<16x64xf32> -> vector<16x64xf32>
      %61 = vector.broadcast %40 : vector<16x1xf32> to vector<16x64xf32>
      %62 = arith.mulf %60, %61 : vector<16x64xf32>
      %63 = arith.truncf %62 : vector<16x64xf32> to vector<16x64xbf16>
      %c0_41 = arith.constant 0 : index
      %c0_42 = arith.constant 0 : index
      %c0_43 = arith.constant 0 : index
      %64 = vector.load %arg8[%c0_41, %c0_42, %c0_43] : memref<1x16x64xbf16, #tpu.memory_space<vmem>>, vector<1x16x64xbf16>
      %65 = vector.shape_cast %64 : vector<1x16x64xbf16> to vector<16x64xbf16>
      %66 = vector.shape_cast %63 : vector<16x64xbf16> to vector<1x16x64xbf16>
      tpu.vector_store %arg8[%c0_41, %c0_42, %c0_43], %66 {strides = array<i32>} : memref<1x16x64xbf16, #tpu.memory_space<vmem>>, vector<1x16x64xbf16>,
      %c0_44 = arith.constant 0 : index
      %c0_45 = arith.constant 0 : index
      %67 = vector.load %arg10[%c0_44, %c0_45] : memref<16x1xf32, #tpu.memory_space<vmem>>, vector<16x1xf32>
      %c0_46 = arith.constant 0 : index
      %c0_47 = arith.constant 0 : index
      %c0_48 = arith.constant 0 : index
      %68 = vector.load %arg9[%c0_46, %c0_47, %c0_48] : memref<1x16x1xf32, #tpu.memory_space<vmem>>, vector<1x16x1xf32>
      %69 = vector.shape_cast %68 : vector<1x16x1xf32> to vector<16x1xf32>
      %70 = vector.shape_cast %67 : vector<16x1xf32> to vector<1x16x1xf32>
      tpu.vector_store %arg9[%c0_46, %c0_47, %c0_48], %70 {strides = array<i32>} : memref<1x16x1xf32, #tpu.memory_space<vmem>>, vector<1x16x1xf32>,
    } else {
    }
    return
  }
  func.func @transform_0(%arg0: i32, %arg1: i32) -> (i32, i32, i32) {
    %c0_i32 = arith.constant 0 : i32
    %c0_i32_0 = arith.constant 0 : i32
    return %arg0, %arg1, %c0_i32 : i32, i32, i32
  }
  func.func @transform_1(%arg0: i32, %arg1: i32) -> (i32, i32, i32) {
    %c0_i32 = arith.constant 0 : i32
    %c0_i32_0 = arith.constant 0 : i32
    %c0_i32_1 = arith.constant 0 : i32
    return %arg0, %c0_i32, %c0_i32_0 : i32, i32, i32
  }
  func.func @transform_2(%arg0: i32, %arg1: i32) -> (i32, i32, i32) {
    %c0_i32 = arith.constant 0 : i32
    %c0_i32_0 = arith.constant 0 : i32
    %c0_i32_1 = arith.constant 0 : i32
    return %arg0, %c0_i32, %c0_i32_0 : i32, i32, i32
  }
  func.func @transform_3(%arg0: i32, %arg1: i32) -> (i32, i32) {
    %c0_i32 = arith.constant 0 : i32
    %c0_i32_0 = arith.constant 0 : i32
    %c0_i32_1 = arith.constant 0 : i32
    return %c0_i32, %c0_i32_0 : i32, i32
  }
  func.func @transform_4(%arg0: i32, %arg1: i32) -> (i32, i32) {
    %c0_i32 = arith.constant 0 : i32
    %c0_i32_0 = arith.constant 0 : i32
    %c0_i32_1 = arith.constant 0 : i32
    return %c0_i32, %c0_i32_0 : i32, i32
  }
  func.func @transform_5(%arg0: i32, %arg1: i32) -> (i32, i32) {
    %c0_i32 = arith.constant 0 : i32
    %c0_i32_0 = arith.constant 0 : i32
    %c0_i32_1 = arith.constant 0 : i32
    return %c0_i32, %c0_i32_0 : i32, i32
  }
  func.func @transform_6(%arg0: i32, %arg1: i32) -> (i32, i32, i32) {
    %c0_i32 = arith.constant 0 : i32
    %c0_i32_0 = arith.constant 0 : i32
    %c0_i32_1 = arith.constant 0 : i32
    return %arg0, %c0_i32, %c0_i32_0 : i32, i32, i32
  }
  func.func @transform_7(%arg0: i32, %arg1: i32) -> (i32, i32, i32) {
    %c0_i32 = arith.constant 0 : i32
    %c0_i32_0 = arith.constant 0 : i32
    %c0_i32_1 = arith.constant 0 : i32
    return %arg0, %c0_i32, %c0_i32_0 : i32, i32, i32
  }
}

</mosaic_0001>

<bundles_post_ra>
// kernel: _lambda_.3
= control target key start
LH: loop header
LB: loop body
LE: loop exit
PB: predicated region body
PF: predicated region fallthrough
CT: control target
= control target key end

     0   :  { %s2320_s0 = inlined_call_operand.hbm [shape: bf16[2,256,64], index: 0, kind: input, shape index: {}]   ;;  %s2321_s1 = inlined_call_operand.hbm [shape: bf16[2,16,64], index: 1, kind: input, shape index: {}]   ;;  %s2322_s2 = inlined_call_operand.hbm [shape: f32[2,1,16], index: 2, kind: input, shape index: {}]   ;;  %s2323_s3 = inlined_call_operand.hbm [shape: bf16[2,16,64], index: 3, kind: input, shape index: {}]   ;;  %s2324_s4 = inlined_call_operand.hbm [shape: f32[1,64], index: 4, kind: input, shape index: {}]   ;;  %s2325_s5 = inlined_call_operand.hbm [shape: f32[2,256,64], index: 5, kind: output, shape index: {}]  }
   0x1   :  { %2355 = sst [smem:[#allocation30_spill]] %s2321_s1 }
   0x2   :  { %2356 = sst [smem:[#allocation31_spill]] %s2324_s4 }
   0x3   :  { %2357 = sst [smem:[#allocation32_spill]] %s2325_s5 }
   0x4   :  { %10 = vsyncpa [#allocation3], 0 }
   0x5   :  { %12 = vsyncpa [#allocation3 + $0x1], 0 }
   0x6   :  { %13 = vsyncpa [#allocation6], 0 }
   0x7   :  { %15 = vsyncpa [#allocation6 + $0x1], 0 }
   0x8   :  { %16 = vsyncpa [#allocation9], 0 }
   0x9   :  { %18 = vsyncpa [#allocation9 + $0x1], 0 }
   0xa   :  { %19 = vsyncpa [#allocation4], 0 }
   0xb   :  { %21 = vsyncpa [#allocation4 + $0x1], 0  ;;  %s1716_s18 = smov 0   ;;  %s1718_s19 = smov 0  }
   0xc   :  { %s1720_s20 = smov 0   ;;  %s1722_s21 = smov 0  }
   0xd   :  { %s1724_s22 = smov 0   ;;  %s1726_s23 = smov 0  }
   0xe   :  { %s1728_s24 = smov 0   ;;  %s1730_s25 = smov 0  }
   0xf   :  { %s1732_s26 = smov 0   ;;  %s1734_s27 = smov 0  }
  0x10   :  { %s1736_s28 = smov 0  }
  0x11 LB: > { %2358 = sst [smem:[#allocation17_spill]] %s1638_s19  ;;  %s1770_s29 = sadd.s32 4294967295, %s1674_s28   ;;  %s1674_s28 = sphi %s1736_s28, %s27_s28   ;;  %s1670_s27 = sphi %s1734_s27, %s2425_s27   ;;  %s1666_s26 = sphi %s1732_s26, %s2418_s26   ;;  %s1662_s25 = sphi %s1730_s25, %s2424_s25   ;;  %s1658_s24 = sphi %s1728_s24, %s2417_s24   ;;  %s1654_s23 = sphi %s1726_s23, %s2423_s23   ;;  %s1650_s22 = sphi %s1724_s22, %s2422_s22   ;;  %s1646_s21 = sphi %s1722_s21, %s2416_s21   ;;  %s1642_s20 = sphi %s1720_s20, %s2421_s20   ;;  %s1638_s19 = sphi %s1718_s19, %s2420_s19   ;;  %s1634_s18 = sphi %s1716_s18, %s2415_s18  }
  0x12   : > { %2359 = sst [smem:[#allocation18_spill]] %s1646_s21  ;;  %s1066_s30 = sadd.s32 4294967294, %s1674_s28  }
  0x13   : > { %2360 = sst [smem:[#allocation19_spill]] %s1650_s22  ;;  %p55_p0 = scmp.ne.s32.totalorder %s1654_s23, %s1650_s22 }
  0x14   : > { %2361 = sst [smem:[#allocation20_spill]] %s1658_s24  ;;  %p56_p1 = scmp.eq.s32.totalorder %s1674_s28, 0 }
  0x15   : > { %2362 = sst [smem:[#allocation21_spill]] %s1662_s25  ;;  %p61_p2 = scmp.ne.s32.totalorder %s1650_s22, %s1646_s21 }
  0x16   : > { %2363 = sst [smem:[#allocation22_spill]] %s1666_s26  ;;  %p2332_p3 = scmp.eq.s32.totalorder %s1770_s29, 0 }
  0x17   : > { %2364 = sst [smem:[#allocation23_spill]] %s1770_s29  ;;  %p1782_p4 = por %p56_p1, %p55_p0 }
  0x18   : > { %p1789_p5 = por %p2332_p3, %p61_p2  ;;  %p81_p6 = scmp.ne.s32.totalorder %s1642_s20, %s1638_s19 }
  0x19   : > { %s2365_s6 = scalar_select %p1782_p4, 1, 0 }
  0x1a   : > { %s2366_s8 = scalar_select %p1789_p5, 1, 0 }
  0x1b   : > { %p87_p7 = scmp.ne.s32.totalorder %s1638_s19, %s1634_s18  ;;  %p186_p8 = scmp.eq.s32.totalorder %s1770_s29, 3 }
  0x1c   : > { %2367 = sst [smem:[#allocation24_spill]] %s2366_s8  ;;  %p1797_p9 = por %p81_p6, %p56_p1 }
  0x1d   : > { %p192_p10 = scmp.eq.s32.totalorder %s1066_s30, 3  ;;  %p1803_p11 = por %p87_p7, %p2332_p3 }
  0x1e   : > { %s2368_s9 = scalar_select %p1797_p9, 1, 0 }
  0x1f   : > { %s2369_s10 = scalar_select %p1803_p11, 1, 0 }
  0x20   : > { %p1810_p12 = por %p186_p8, %p55_p0  ;;  %p1814_p13 = por %p192_p10, %p61_p2 }
  0x21   : > { %2370 = sst [smem:[#allocation25_spill]] %s2369_s10  ;;  %p1067_p5 = scmp.ge.s32.totalorder %s1674_s28, 1 }
  0x22   : > { %s2371_s11 = scalar_select %p1810_p12, 1, 0 }
  0x23   : > { %s2373_s12 = scalar_select %p1814_p13, 1, 0 }
  0x24   : > { %2372 = sst [smem:[#allocation26_spill]] %s2371_s11  ;;  %p199_p1 = scmp.lt.s32.totalorder %s1674_s28, 5 }
  0x25   : > { %2374 = sst [smem:[#allocation27_spill]] %s2373_s12  ;;  %s1676_s14 = smov [#allocation10]  }
  0x26   : > { %p1820_p6 = pnand %p1067_p5, %p199_p1  ;;  %s212_s15 = sshll.u32 %s1676_s14, 4  ;;  %s213_s15 = int_to_ptr.vmem [resolvable:$true] %s212_s15 }
  0x27   : > { %s2336_s18 = sand.u32 1, %s1642_s20   ;;  %s2377_s4 = sld [smem:[#allocation31_spill]] }
  0x28   : > { %s2375_s13 = scalar_select %p1820_p6, 1, 0 }
  0x29   : > { %p1192_p7 = pneg %p1820_p6 }
  0x2b   : > { %p1829_p8 = pnand %p1192_p7, %p2332_p3 }
  0x2d   : > { %s1392_s12 = scalar_lea.hbm %s2377_s4, 16  ;;  %p1394_p5 = pneg %p1829_p8 }
  0x2e   : > { %p1393_p2 = scmp.ne.s32.totalorder %s2377_s4, %s1392_s12  ;;  %p1399_p7 = scmp.lt.u32.totalorder %s1392_s12, %s2377_s4 }
  0x30   : > { %p1395_p10 = pnand %p1394_p5, %p1393_p2 }
  0x32   : > { %p1396_p1 = pneg %p1395_p10 }
  0x34   : > { %p1401_p3 = pnand %p1399_p7, %p1396_p1 }
  0x36   : > { %1404 = shalt.err (!%p1401_p3)
}
  0x37   : > { %s1405_s17 = scalar_lea.vmem %s213_s15, 16  ;;  %s1412_s7 = scalar_lea.vmem %s213_s15, 32 }
  0x38   : > { %p1406_p0 = scmp.ne.s32.totalorder %s213_s15, %s1405_s17  ;;  %p1413_p11 = scmp.lt.s32.totalorder %s213_s15, %s213_s15 }
  0x39   : > { %p1414_p6 = scmp.lt.s32.totalorder %s1412_s7, %s1405_s17 }
  0x3a   : > { %p1408_p13 = pnand %p1406_p0, %p1394_p5 }
  0x3b   : > { %p1415_p4 = por %p1414_p6, %p1413_p11 }
  0x3c   : > { %p1409_p12 = pneg %p1408_p13 }
  0x3e   : > { %p1416_p9 = pnand %p1415_p4, %p1409_p12 }
  0x40   : > { %1419 = shalt.err (!%p1416_p9)
}
  0x41   : > { %1195 = dma.hbm_to_vmem [thread:$0]  (!%p1829_p8), %s2377_s4, 16, %s213_s15, [#allocation9]  }
  0x42   : > { %s1853_s11 = sshll.u32 %s2336_s18, 3  ;;  %s2337_s12 = sshll.u32 %s1670_s27, 7 }
  0x43   : > { %s2378_s1 = sld [smem:[#allocation30_spill]]  ;;  %s250_s14 = scalar_lea.vmem [#allocation5], %s1853_s11 }
  0x44   : > { %s257_s7 = sshll.u32 %s250_s14, 4  ;;  %p2379_p3 = scmp.ne.s32.totalorder %s2368_s9, 0  ;;  %s1872_s7 = int_to_ptr.vmem [resolvable:$true] %s257_s7 }
  0x45   : > { %p2380_p4 = scmp.lt.s32.totalorder %s1674_s28, 4  ;;  %s2382_s5 = sand.u32 1, %s1674_s28  }
  0x46   : > { %s1876_s21 = scalar_lea.sflag [#allocation6], %s2382_s5 }
  0x47   : > { %p1868_p9 = pnand %p2380_p4, %p2379_p3 }
  0x49   : > { %s1861_s16 = scalar_lea.hbm %s2378_s1, %s2337_s12  ;;  %p1882_p12 = pneg %p1868_p9 }
  0x4a   : > { %s2381_s15 = scalar_select %p1868_p9, 1, 0 }
  0x4b   : > { %s1420_s17 = scalar_lea.hbm %s1861_s16, 128  ;;  %s1425_s18 = scalar_lea.hbm %s2378_s1, 256 }
  0x4c   : > { %p1421_p11 = scmp.ne.s32.totalorder %s1861_s16, %s1420_s17  ;;  %p1426_p0 = scmp.lt.u32.totalorder %s1861_s16, %s2378_s1 }
  0x4d   : > { %p1427_p8 = scmp.lt.u32.totalorder %s1425_s18, %s1420_s17  ;;  %p1429_p5 = scmp.lt.u32.totalorder %s1420_s17, %s1861_s16 }
  0x4e   : > { %p1423_p13 = pnand %p1882_p12, %p1421_p11 }
  0x4f   : > { %p1428_p2 = por %p1427_p8, %p1426_p0 }
  0x50   : > { %p1424_p6 = pneg %p1423_p13 }
  0x51   : > { %p1430_p10 = por %p1429_p5, %p1428_p2 }
  0x53   : > { %p1431_p1 = pnand %p1430_p10, %p1424_p6 }
  0x55   : > { %1434 = shalt.err (!%p1431_p1)
}
  0x56   : > { %s1435_s5 = scalar_lea.vmem %s1872_s7, 128  ;;  %s1677_s9 = smov [#allocation5]  }
  0x57   : > { %p1436_p7 = scmp.ne.s32.totalorder %s1872_s7, %s1435_s5  ;;  %s1440_s14 = sshll.u32 %s1677_s9, 4  ;;  %s1441_s14 = int_to_ptr.vmem [resolvable:$false] %s1440_s14 }
  0x58   : > { %s1442_s4 = scalar_lea.vmem %s1441_s14, 256  ;;  %p1443_p11 = scmp.lt.s32.totalorder %s1872_s7, %s1441_s14 }
  0x59   : > { %p1438_p3 = pnand %p1436_p7, %p1882_p12  ;;  %p1444_p13 = scmp.lt.s32.totalorder %s1442_s4, %s1435_s5 }
  0x5b   : > { %p1439_p4 = pneg %p1438_p3  ;;  %p1445_p0 = por %p1444_p13, %p1443_p11 }
  0x5d   : > { %p1446_p8 = pnand %p1445_p0, %p1439_p4 }
  0x5f   : > { %1449 = shalt.err (!%p1446_p8)
}
  0x60   : > { %s2343_s18 = smov 64   ;;  %s2345_s12 = smov 4  }
  0x61   : > { %1202 = dma.hbm_to_vmem [thread:$0]  (!%p1868_p9), %s1861_s16, 128, %s1872_s7, %s1876_s21, %s2343_s18, %s2343_s18, %s2345_s12  }
  0x62   : > { %s2384_s17 = sshll.u32 %s1670_s27, 7  ;;  %s288_s4 = scalar_lea.vmem [#allocation8], %s1853_s11 }
  0x63   : > { %s1914_s14 = scalar_lea.hbm %s2323_s3, %s2384_s17  ;;  %s295_s1 = sshll.u32 %s288_s4, 4  ;;  %s1917_s1 = int_to_ptr.vmem [resolvable:$true] %s295_s1 }
  0x64   : > { %s39_s25 = sadd.s32 1, %s1670_s27  ;;  %s36_s24 = sadd.s32 1, %s1666_s26 }
  0x65   : > { %s48_s10 = sadd.s32 1, %s1654_s23  ;;  %p37_p6 = scmp.ge.s32.totalorder %s36_s24, 2 }
  0x66   : > { %s223_s19 = sand.u32 1, %s1654_s23   ;;  %s1071_s11 = sshll.u32 %s1666_s26, 4 }
  0x67   : > { %s1070_s29 = sshll.u32 %s223_s19, 6  ;;  %s2427_s24 = smov (%p37_p6, %s36_s24), 0 }
  0x68   : > { %2385 = sst [smem:[#allocation28_spill]] %s2427_s24  ;;  %s2429_s25 = smov (!%p37_p6, %s39_s25), %s1670_s27 }
  0x69   : > { %s44_s16 = ssub.s32 %s1666_s26, %s2427_s24  ;;  %p41_p2 = scmp.ge.s32.totalorder %s2429_s25, 2 }
  0x6a   : > { %s1072_s7 = sshll.u32 %s1670_s27, 5  ;;  %s227_s17 = scalar_lea.vmem [#allocation2], %s1070_s29 }
  0x6b   : > { %s236_s5 = sshll.u32 %s227_s17, 4  ;;  %s2431_s25 = smov (%p41_p2, %s2429_s25), 0  ;;  %s1932_s5 = int_to_ptr.vmem [resolvable:$true] %s236_s5 }
  0x6c   : > { %2386 = sst [smem:[#allocation29_spill]] %s2431_s25  ;;  %s233_s9 = sadd.s32 %s1072_s7, %s1071_s11 }
  0x6d   : > { %s43_s4 = ssub.s32 %s1670_s27, %s2431_s25  ;;  %s1073_s18 = sshll.u32 %s233_s9, 6 }
  0x6e   : > { %s45_s12 = sor.u32 %s44_s16, %s43_s4  ;;  %p72_p5 = scmp.eq.s32.totalorder %s43_s4, 0 }
  0x6f   : > { %p46_p10 = scmp.eq.s32.totalorder %s45_s12, 0  ;;  %s1939_s26 = scalar_lea.hbm %s2320_s0, %s1073_s18 }
  0x70   : > { %s2387_s22 = sadd.s32 1, %s1642_s20  ;;  %p2388_p1 = scmp.ne.s32.totalorder %s2365_s6, 0 }
  0x71   : > { %s1944_s29 = scalar_select %p72_p5, %s1642_s20, %s2387_s22  }
  0x72   : > { %s1947_s17 = scalar_select %p46_p10, %s1654_s23, %s48_s10  }
  0x73   : > { %p2389_p7 = scmp.lt.s32.totalorder %s1674_s28, 4  ;;  %s1077_s24 = sshll.u32 %s1670_s27, 4 }
  0x74   : > { %s2391_s8 = sand.u32 1, %s1642_s20   ;;  %s1966_s10 = scalar_lea.hbm %s2322_s2, %s1077_s24 }
  0x75   : > { %p1953_p3 = pnand %p2389_p7, %p2388_p1  ;;  %s1960_s18 = scalar_lea.vmem [#allocation7], %s2391_s8 }
  0x76   : > { %s1968_s6 = scalar_lea.sflag [#allocation3], %s223_s19  ;;  %s1450_s7 = scalar_lea.hbm %s1939_s26, 1024 }
  0x77   : > { %p1451_p4 = scmp.ne.s32.totalorder %s1939_s26, %s1450_s7  ;;  %p1452_p11 = pneg %p1953_p3 }
  0x78   : > { %s1455_s8 = scalar_lea.hbm %s2320_s0, 4096  ;;  %p1456_p8 = scmp.lt.u32.totalorder %s1939_s26, %s2320_s0 }
  0x79   : > { %p1453_p13 = pnand %p1452_p11, %p1451_p4  ;;  %p1457_p6 = scmp.lt.u32.totalorder %s1455_s8, %s1450_s7 }
  0x7a   : > { %p1459_p5 = scmp.lt.u32.totalorder %s1450_s7, %s1939_s26 }
  0x7b   : > { %p1454_p0 = pneg %p1453_p13  ;;  %p1458_p2 = por %p1457_p6, %p1456_p8 }
  0x7d   : > { %p1460_p10 = por %p1459_p5, %p1458_p2 }
  0x7f   : > { %p1461_p1 = pnand %p1460_p10, %p1454_p0 }
  0x81   : > { %1464 = shalt.err (!%p1461_p1)
}
  0x82   : > { %s1465_s19 = scalar_lea.vmem %s1932_s5, 1024  ;;  %s1680_s24 = smov [#allocation2]  }
  0x83   : > { %p1466_p7 = scmp.ne.s32.totalorder %s1932_s5, %s1465_s19  ;;  %s1470_s11 = sshll.u32 %s1680_s24, 4  ;;  %s1471_s11 = int_to_ptr.vmem [resolvable:$false] %s1470_s11 }
  0x84   : > { %s1472_s25 = scalar_lea.vmem %s1471_s11, 2048  ;;  %p1473_p9 = scmp.lt.s32.totalorder %s1932_s5, %s1471_s11 }
  0x85   : > { %p1468_p4 = pnand %p1466_p7, %p1452_p11  ;;  %p1474_p8 = scmp.lt.s32.totalorder %s1472_s25, %s1465_s19 }
  0x87   : > { %p1469_p13 = pneg %p1468_p4  ;;  %p1475_p6 = por %p1474_p8, %p1473_p9 }
  0x89   : > { %p1476_p2 = pnand %p1475_p6, %p1469_p13 }
  0x8b   : > { %1479 = shalt.err (!%p1476_p2)
}
  0x8c   : > { %s2392_s12 = smov 4   ;;  %s2393_s22 = smov 64  }
  0x8d   : > { %1199 = dma.hbm_to_vmem [thread:$0]  (!%p1953_p3), %s1939_s26, 1024, %s1932_s5, %s1968_s6, %s2393_s22, %s2393_s22, %s2392_s12  }
  0x8e   : > { %s2394_s7 = sshll.u32 %s1960_s18, 4  ;;  %s1480_s9 = scalar_lea.hbm %s1966_s10, 16  ;;  %s278_s7 = int_to_ptr.vmem [resolvable:$true] %s2394_s7 }
  0x8f   : > { %p1481_p9 = scmp.ne.s32.totalorder %s1966_s10, %s1480_s9  ;;  %s1485_s8 = scalar_lea.hbm %s2322_s2, 32 }
  0x90   : > { %p1486_p5 = scmp.lt.u32.totalorder %s1966_s10, %s2322_s2  ;;  %p1487_p10 = scmp.lt.u32.totalorder %s1485_s8, %s1480_s9 }
  0x91   : > { %p1483_p11 = pnand %p1481_p9, %p1882_p12  ;;  %p1489_p7 = scmp.lt.u32.totalorder %s1480_s9, %s1966_s10 }
  0x92   : > { %p1488_p1 = por %p1487_p10, %p1486_p5 }
  0x93   : > { %p1484_p0 = pneg %p1483_p11 }
  0x94   : > { %p1490_p4 = por %p1489_p7, %p1488_p1 }
  0x96   : > { %p1491_p3 = pnand %p1490_p4, %p1484_p0 }
  0x98   : > { %1494 = shalt.err (!%p1491_p3)
}
  0x99   : > { %s1495_s26 = scalar_lea.vmem %s278_s7, 16  ;;  %s1681_s5 = smov [#allocation7]  }
  0x9a   : > { %p1496_p13 = scmp.ne.s32.totalorder %s278_s7, %s1495_s26  ;;  %s1500_s18 = sshll.u32 %s1681_s5, 4  ;;  %s1501_s18 = int_to_ptr.vmem [resolvable:$false] %s1500_s18 }
  0x9b   : > { %s1502_s6 = scalar_lea.vmem %s1501_s18, 32  ;;  %p1503_p2 = scmp.lt.s32.totalorder %s278_s7, %s1501_s18 }
  0x9c   : > { %p1498_p8 = pnand %p1496_p13, %p1882_p12  ;;  %p1504_p9 = scmp.lt.s32.totalorder %s1502_s6, %s1495_s26 }
  0x9e   : > { %p1499_p6 = pneg %p1498_p8  ;;  %p1505_p11 = por %p1504_p9, %p1503_p2 }
  0xa0   : > { %p1506_p5 = pnand %p1505_p11, %p1499_p6 }
  0xa2   : > { %1509 = shalt.err (!%p1506_p5)
}
  0xa3   : > { %p2395_p10 = scmp.ne.s32.totalorder %s2381_s15, 0  ;;  %s2396_s11 = sand.u32 1, %s1674_s28  }
  0xa4   : > { %s2021_s25 = scalar_lea.sflag [#allocation9], %s2396_s11  ;;  %s1510_s9 = scalar_lea.hbm %s1914_s14, 128 }
  0xa5   : > { %1205 = dma.hbm_to_vmem [thread:$0]  (!%p2395_p10), %s1966_s10, 16, %s278_s7, %s1876_s21  }
  0xa6   : > { %p1511_p0 = scmp.ne.s32.totalorder %s1914_s14, %s1510_s9  ;;  %s1515_s8 = scalar_lea.hbm %s2323_s3, 256 }
  0xa7   : > { %p1516_p4 = scmp.lt.u32.totalorder %s1914_s14, %s2323_s3  ;;  %p1517_p3 = scmp.lt.u32.totalorder %s1515_s8, %s1510_s9 }
  0xa8   : > { %p1513_p1 = pnand %p1511_p0, %p1882_p12  ;;  %p1519_p8 = scmp.lt.u32.totalorder %s1510_s9, %s1914_s14 }
  0xa9   : > { %p1518_p13 = por %p1517_p3, %p1516_p4 }
  0xaa   : > { %p1514_p7 = pneg %p1513_p1 }
  0xab   : > { %p1520_p6 = por %p1519_p8, %p1518_p13 }
  0xad   : > { %p1521_p2 = pnand %p1520_p6, %p1514_p7 }
  0xaf   : > { %1524 = shalt.err (!%p1521_p2)
}
  0xb0   : > { %s1525_s21 = scalar_lea.vmem %s1917_s1, 128  ;;  %s1682_s10 = smov [#allocation8]  }
  0xb1   : > { %p1526_p9 = scmp.ne.s32.totalorder %s1917_s1, %s1525_s21  ;;  %s1530_s7 = sshll.u32 %s1682_s10, 4  ;;  %s1531_s7 = int_to_ptr.vmem [resolvable:$false] %s1530_s7 }
  0xb2   : > { %s1532_s26 = scalar_lea.vmem %s1531_s7, 256  ;;  %p1533_p0 = scmp.lt.s32.totalorder %s1917_s1, %s1531_s7 }
  0xb3   : > { %p1528_p11 = pnand %p1526_p9, %p1882_p12  ;;  %p1534_p1 = scmp.lt.s32.totalorder %s1532_s26, %s1525_s21 }
  0xb5   : > { %p1529_p5 = pneg %p1528_p11  ;;  %p1535_p4 = por %p1534_p1, %p1533_p0 }
  0xb7   : > { %p1536_p3 = pnand %p1535_p4, %p1529_p5 }
  0xb9   : > { %1539 = shalt.err (!%p1536_p3)
}
  0xba   : > { %1208 = dma.hbm_to_vmem [thread:$0]  (!%p2395_p10), %s1914_s14, 128, %s1917_s1, %s2021_s25, %s2393_s22, %s2393_s22, %s2392_s12  }
  0xbb   : > { %p2397_p12 = scmp.ne.s32.totalorder %s2375_s13, 0 }
  0xbc   : > { %s2398_s30 = sld [smem:[#allocation19_spill]] (!%p2397_p12) }
  0xbd   : > { %307 = sbr.rel (%p2397_p12) target bundleno = 733 (0x2dd), region = 40  ;;  %s2399_s5 = sld [smem:[#allocation24_spill]] (!%p2397_p12) }
  0xc2   : > { %s2051_s18 = sand.u32 (!%p2397_p12), 1, %s2398_s30  }
  0xc3   : > { %s1082_s6 = sshll.u32 (!%p2397_p12), %s2051_s18, 6  ;;  %s310_s11 = scalar_lea.sflag (!%p2397_p12), [#allocation3], %s2051_s18 }
  0xc4   : > { %s2055_s9 = scalar_lea.vmem [#allocation2], %s1082_s6  ;;  %p2400_p7 = scmp.ne.s32.totalorder %s2399_s5, 0 }
  0xc6   : > { %1613 = dma.done.wait (%p2400_p7), %s310_s11, 1024  }
  0xc7   : > { %1615 = vsyncadd (%p2400_p7), %s310_s11, 4294966272  ;;  %s2401_s15 = sld [smem:[#allocation23_spill]]  ;;  %s2403_s14 = sld [smem:[#allocation25_spill]] }
  0xc8   : > { %s2402_s1 = sld [smem:[#allocation17_spill]] }
  0xcd   : > { %s318_s13 = sand.u32 1, %s2401_s15   ;;  %p2404_p10 = scmp.ne.s32.totalorder %s2403_s14, 0 }
  0xce   : > { %s320_s12 = sand.u32 1, %s2402_s1   ;;  %s319_s25 = scalar_lea.sflag [#allocation6], %s318_s13 }
  0xcf   : > { %s2063_s22 = sshll.u32 %s320_s12, 3 }
  0xd0   : > { %s322_s16 = scalar_lea.vmem [#allocation5], %s2063_s22 }
  0xd1   : > { %1617 = dma.done.wait (%p2404_p10), %s319_s25, 144  }
  0xd2   : > { %1619 = vsyncadd (%p2404_p10), %s319_s25, 4294967152  ;;  %s2070_s4 = scalar_lea.vmem [#allocation7], %s320_s12  ;;  %s336_s8 = scalar_lea.sflag [#allocation9], %s318_s13 }
  0xd3   : > { %s339_s19 = scalar_lea.vmem [#allocation8], %s2063_s22 }
  0xd4   : > { %1621 = dma.done.wait (%p2404_p10), %s336_s8, 128  }
  0xd5   : > { %1623 = vsyncadd (%p2404_p10), %s336_s8, 4294967168  ;;  %p2405_p13 = scmp.eq.s32.totalorder %s2401_s15, 0 }
  0xd7   : > { %1625 = dma.done.wait (%p2405_p13), [#allocation9], 16   ;;  %p2406_p8 = pmov %p2405_p13 }
  0xd8   : > { %vm457_vm0 = vcmask 523264   ;;  %v1310_v0 = vld [vmem:[%s322_s16] sm:$0xff]   ;;  %v2092_v4 = vld [vmem:[%s2055_s9 + $0x10] sm:$0xff]   ;;  %v2099_v5 = vld [vmem:[%s2055_s9 + $0x18] sm:$0xff]   ;;  %vm637_vm1 = vcmask 130048   ;;  %s1086_s24 = sshll.u32 %s2051_s18, 7 }
  0xd9   : > { %1627 = vsyncadd (%p2406_p8), [#allocation9], 4294967280  ;;  %v2082_v1 = vld [vmem:[%s2055_s9] sm:$0xff]   ;;  %1177 = vmatprep.subr.msk.bf16.mxu0 %vm457_vm0, %v1310_v0  ;;  %v483_v2 = vsel %vm457_vm0, %v1310_v0, 0  ;;  %v2087_v3 = vld [vmem:[%s2055_s9 + $0x8] sm:$0xff]   ;;  %s2188_s21 = scalar_lea.vmem [#allocation11], %s1086_s24 }
  0xda   : > { %1142 = vmatpush3.bf16.xpose.msra.mxu0 %v483_v2  ;;  %1143 = vmatprep.mubr.msk.bf16.mxu0 %vm457_vm0, %v2082_v1  ;;  %v2102_v6 = vld [vmem:[%s2055_s9 + $0x20] sm:$0xff]   ;;  %v2109_v7 = vld [vmem:[%s2055_s9 + $0x28] sm:$0xff]   ;;  %v2112_v8 = vld [vmem:[%s2055_s9 + $0x30] sm:$0xff]   ;;  %s2407_s10 = sld [smem:[#allocation20_spill]]  ;;  %s2408_s7 = sld [smem:[#allocation21_spill]] }
  0xdb   : > { %v2119_v9 = vld [vmem:[%s2055_s9 + $0x38] sm:$0xff]   ;;  %v2124_v11 = vld [vmem:[%s2070_s4] ss:$0 sm:$0xff]  ;;  %s2409_s6 = sld [smem:[#allocation26_spill]]  ;;  %s903_s9 = sshll.u32 %s2188_s21, 4  ;;  %s2253_s9 = int_to_ptr.vmem [resolvable:$true] %s903_s9 }
  0xdc   : > { %v1319_v10 = vld [vmem:[%s339_s19] sm:$0xff]   ;;  %s2410_s14 = sld [smem:[#allocation32_spill]]  ;;  %s888_s12 = scalar_lea.sflag [#allocation4], %s2051_s18 }
  0xdd   : > { %1159 = vmatprep.subr.bf16.mxu1 %v1319_v10  ;;  %s1540_s22 = scalar_lea.vmem %s2253_s9, 2048  ;;  %s1683_s25 = smov [#allocation11]  }
  0xde   : > { %1160 = vmatpush3.bf16.msra.mxu1 %v1319_v10  ;;  %p1541_p6 = scmp.ne.s32.totalorder %s2253_s9, %s1540_s22  ;;  %s1544_s16 = sshll.u32 %s1683_s25, 4  ;;  %s1545_s16 = int_to_ptr.vmem [resolvable:$false] %s1544_s16 }
  0xdf   : > { %s1546_s4 = scalar_lea.vmem %s1545_s16, 4096  ;;  %p1547_p5 = scmp.lt.s32.totalorder %s2253_s9, %s1545_s16 }
  0xe0   : > { %s1116_s26 = sshll.u32 %s2407_s10, 4  ;;  %s1117_s30 = sshll.u32 %s2408_s7, 5 }
  0xe1   : > { %1144 = vmatmul.mubr.msk.bf16.vlgmr.msra.gmra.mrb[0].mxu0 %vm457_vm0, %v2087_v3  ;;  %s900_s5 = sadd.s32 %s1117_s30, %s1116_s26  ;;  %p2411_p2 = scmp.ne.s32.totalorder %s2409_s6, 0 }
  0xe2   : > { %1147 = vmatprep.mubr.msk.bf16.mxu0 %vm457_vm0, %v2092_v4  ;;  %s1118_s11 = sshll.u32 %s900_s5, 7  ;;  %p1548_p0 = scmp.lt.s32.totalorder %s1546_s4, %s1540_s22 }
  0xe3   : > { %s2251_s13 = scalar_lea.hbm %s2410_s14, %s1118_s11  ;;  %p1542_p9 = pnand %p1541_p6, %p2411_p2 }
  0xe4   : > { %p1549_p1 = por %p1548_p0, %p1547_p5 }
  0xe5   : > { %p1543_p11 = pneg %p1542_p9 }
  0xe7   : > { %p1550_p4 = pnand %p1549_p1, %p1543_p11 }
  0xe9   : > { %1148 = vmatmul.mubr.msk.bf16.gmra.mrb[4].mxu0 %vm457_vm0, %v2099_v5 }
  0xea   : > { %1151 = vmatprep.mubr.msk.bf16.mxu0 %vm457_vm0, %v2102_v6 }
  0xf1   : > { %1152 = vmatmul.mubr.msk.bf16.gmra.mrb[8].mxu0 %vm457_vm0, %v2109_v7 }
  0xf2   : > { %1155 = vmatprep.mubr.msk.bf16.mxu0 %vm457_vm0, %v2112_v8 }
  0xf9   : > { %1156 = vmatmul.mubr.msk.bf16.gmra.mrb[12].mxu0 %vm457_vm0, %v2119_v9 }
 0x1b4   : > { %v1145_v12 = vpop.f32.mrb[0].mxu0 }
 0x1b5   : > { %v528_v13 = vadd.f32 %v1145_v12, %v2124_v11  ;;  %v519_v14 = vpop.f32.mrb[1].mxu0 }
 0x1b6   : > { %v520_v15 = vadd.f32 %v2124_v11, %v519_v14  ;;  %v1146_v16 = vpop.f32.mrb[2].mxu0 }
 0x1b7   : > { %v586_v17 = vmul.f32 1.442695, %v528_v13  ;;  %v531_v18 = vadd.f32 %v1146_v16, %v2124_v11  ;;  %v522_v19 = vpop.f32.mrb[3].mxu0 }
 0x1b8   : > { %v582_v20 = vmul.f32 1.442695, %v520_v15  ;;  %v523_v21 = vadd.f32 %v2124_v11, %v522_v19 }
 0x1b9   : > { %1328 = vpow2.f32 %v586_v17  ;;  %v588_v22 = vmul.f32 1.442695, %v531_v18 }
 0x1ba   : > { %1330 = vpow2.f32 %v582_v20  ;;  %v584_v23 = vmul.f32 1.442695, %v523_v21 }
 0x1bb   : > { %1332 = vpow2.f32 %v588_v22 }
 0x1bc   : > { %1334 = vpow2.f32 %v584_v23  ;;  %v1149_v24 = vpop.f32.mrb[4].mxu0 }
 0x1bd   : > { %v544_v25 = vadd.f32 %v1149_v24, %v2124_v11  ;;  %v535_v26 = vpop.f32.mrb[5].mxu0 }
 0x1be   : > { %v536_v27 = vadd.f32 %v2124_v11, %v535_v26  ;;  %v1150_v28 = vpop.f32.mrb[6].mxu0 }
 0x1bf   : > { %v594_v29 = vmul.f32 1.442695, %v544_v25  ;;  %v547_v30 = vadd.f32 %v1150_v28, %v2124_v11  ;;  %v538_v31 = vpop.f32.mrb[7].mxu0  ;;  %v2150_v28 = vld [vmem:[#allocation10] ss:$0 sm:$0xff] }
 0x1c0   : > { %v590_v32 = vmul.f32 1.442695, %v536_v27  ;;  %v539_v33 = vadd.f32 %v2124_v11, %v538_v31 }
 0x1c1   : > { %1336 = vpow2.f32 %v594_v29  ;;  %v596_v34 = vmul.f32 1.442695, %v547_v30 }
 0x1c2   : > { %1338 = vpow2.f32 %v590_v32  ;;  %v592_v35 = vmul.f32 1.442695, %v539_v33 }
 0x1c3   : > { %v1329_v36 = vpop.eup %1328  ;;  %1340 = vpow2.f32 %v596_v34 }
 0x1c4   : > { %v1331_v37 = vpop.eup %1330  ;;  %1342 = vpow2.f32 %v592_v35  ;;  %v1153_v38 = vpop.f32.mrb[8].mxu0 }
 0x1c5   : > { %v1333_v39 = vpop.eup %1332  ;;  %v560_v40 = vadd.f32 %v1153_v38, %v2124_v11  ;;  %v551_v41 = vpop.f32.mrb[9].mxu0 }
 0x1c6   : > { %v1335_v42 = vpop.eup %1334  ;;  %v552_v43 = vadd.f32 %v2124_v11, %v551_v41  ;;  %v1154_v44 = vpop.f32.mrb[10].mxu0  ;;  %v615_v45 = vpack.c.bf16 %v1333_v39, %v1329_v36 }
 0x1c7   : > { %v602_v46 = vmul.f32 1.442695, %v560_v40  ;;  %v563_v47 = vadd.f32 %v1154_v44, %v2124_v11  ;;  %v554_v48 = vpop.f32.mrb[11].mxu0  ;;  %v614_v49 = vpack.c.bf16 %v1335_v42, %v1331_v37 }
 0x1c8   : > { %v598_v50 = vmul.f32 1.442695, %v552_v43  ;;  %v555_v51 = vadd.f32 %v2124_v11, %v554_v48 }
 0x1c9   : > { %1344 = vpow2.f32 %v602_v46  ;;  %v604_v52 = vmul.f32 1.442695, %v563_v47  ;;  %1161 = vmatprep.mubr.msk.bf16.mxu1 %vm637_vm1, %v614_v49 }
 0x1ca   : > { %1346 = vpow2.f32 %v598_v50  ;;  %v600_v53 = vmul.f32 1.442695, %v555_v51  ;;  %1162 = vmatmul.mubr.msk.bf16.vlgmr.msra.gmra.mrb[0].mxu1 %vm637_vm1, %v615_v45 }
 0x1cb   : > { %v1337_v54 = vpop.eup %1336  ;;  %1348 = vpow2.f32 %v604_v52 }
 0x1cc   : > { %v1339_v55 = vpop.eup %1338  ;;  %1350 = vpow2.f32 %v600_v53  ;;  %v1157_v56 = vpop.f32.mrb[12].mxu0 }
 0x1cd   : > { %v1341_v57 = vpop.eup %1340  ;;  %v576_v58 = vadd.f32 %v1157_v56, %v2124_v11  ;;  %v567_v59 = vpop.f32.mrb[13].mxu0 }
 0x1ce   : > { %v1343_v60 = vpop.eup %1342  ;;  %v568_v61 = vadd.f32 %v2124_v11, %v567_v59  ;;  %v1158_v62 = vpop.f32.mrb[14].mxu0  ;;  %v617_v63 = vpack.c.bf16 %v1341_v57, %v1337_v54  ;;  %v839_v54 = vunpack.c.l.bf16 %v2082_v1  ;;  %v841_v59 = vunpack.c.l.bf16 %v2087_v3 }
 0x1cf   : > { %v610_v0 = vmul.f32 1.442695, %v576_v58  ;;  %v579_v2 = vadd.f32 %v1158_v62, %v2124_v11  ;;  %v570_v10 = vpop.f32.mrb[15].mxu0  ;;  %v616_v12 = vpack.c.bf16 %v1343_v60, %v1339_v55  ;;  %v840_v55 = vunpack.c.h.bf16 %v2082_v1 }
 0x1d0   : > { %v606_v13 = vmul.f32 1.442695, %v568_v61  ;;  %v571_v14 = vadd.f32 %v2124_v11, %v570_v10 }
 0x1d1   : > { %1352 = vpow2.f32 %v610_v0  ;;  %v612_v15 = vmul.f32 1.442695, %v579_v2  ;;  %1165 = vmatprep.mubr.msk.bf16.mxu1 %vm637_vm1, %v616_v12  ;;  %v842_v0 = vunpack.c.h.bf16 %v2087_v3 }
 0x1d2   : > { %1354 = vpow2.f32 %v606_v13  ;;  %v608_v16 = vmul.f32 1.442695, %v571_v14  ;;  %1166 = vmatmul.mubr.msk.bf16.gmra.mrb[4].mxu1 %vm637_vm1, %v617_v63 }
 0x1d3   : > { %v1345_v17 = vpop.eup %1344  ;;  %1356 = vpow2.f32 %v612_v15 }
 0x1d4   : > { %v1347_v18 = vpop.eup %1346  ;;  %1358 = vpow2.f32 %v608_v16 }
 0x1d5   : > { %v1349_v19 = vpop.eup %1348 }
 0x1d6   : > { %v1351_v20 = vpop.eup %1350  ;;  %v619_v21 = vpack.c.bf16 %v1349_v19, %v1345_v17 }
 0x1d7   : > { %v618_v22 = vpack.c.bf16 %v1351_v20, %v1347_v18 }
 0x1d9   : > { %1169 = vmatprep.mubr.msk.bf16.mxu1 %vm637_vm1, %v618_v22 }
 0x1da   : > { %1170 = vmatmul.mubr.msk.bf16.gmra.mrb[8].mxu1 %vm637_vm1, %v619_v21 }
 0x1db   : > { %v1353_v11 = vpop.eup %1352 }
 0x1dc   : > { %v1355_v23 = vpop.eup %1354 }
 0x1dd   : > { %v1357_v24 = vpop.eup %1356 }
 0x1de   : > { %v1359_v25 = vpop.eup %1358  ;;  %v621_v26 = vpack.c.bf16 %v1357_v24, %v1353_v11  ;;  %v845_v11 = vunpack.c.l.bf16 %v2099_v5 }
 0x1df   : > { %v620_v27 = vpack.c.bf16 %v1359_v25, %v1355_v23 }
 0x1e1   : > { %1173 = vmatprep.mubr.msk.bf16.mxu1 %vm637_vm1, %v620_v27 }
 0x1e2   : > { %1174 = vmatmul.mubr.msk.bf16.gmra.mrb[12].mxu1 %vm637_vm1, %v621_v26 }
 0x29d   : > { %v1163_v29 = vpop.f32.mrb[0].mxu1 }
 0x29e   : > { %v705_v30 = vadd.f32 %v1163_v29, %v2150_v28  ;;  %v696_v31 = vpop.f32.mrb[1].mxu1  ;;  %v843_v29 = vunpack.c.l.bf16 %v2092_v4 }
 0x29f   : > { %v697_v32 = vadd.f32 %v2150_v28, %v696_v31  ;;  %v1164_v33 = vpop.f32.mrb[2].mxu1 }
 0x2a0   : > { %v777_v34 = vmul.f32 0.70710677, %v705_v30  ;;  %v708_v35 = vadd.f32 %v1164_v33, %v2150_v28  ;;  %v699_v36 = vpop.f32.mrb[3].mxu1  ;;  %v761_v57 = vmul.f32 0.5, %v705_v30  ;;  %v846_v33 = vunpack.c.h.bf16 %v2099_v5 }
 0x2a1   : > { %v775_v37 = vmul.f32 0.70710677, %v697_v32  ;;  %v700_v38 = vadd.f32 %v2150_v28, %v699_v36  ;;  %v759_v62 = vmul.f32 0.5, %v697_v32 }
 0x2a2   : > { %1360 = verf.f32 %v777_v34  ;;  %v778_v39 = vmul.f32 0.70710677, %v708_v35  ;;  %v762_v13 = vmul.f32 0.5, %v708_v35  ;;  %v844_v34 = vunpack.c.h.bf16 %v2092_v4 }
 0x2a3   : > { %1362 = verf.f32 %v775_v37  ;;  %v776_v40 = vmul.f32 0.70710677, %v700_v38  ;;  %v760_v18 = vmul.f32 0.5, %v700_v38 }
 0x2a4   : > { %1364 = verf.f32 %v778_v39 }
 0x2a5   : > { %1366 = verf.f32 %v776_v40  ;;  %v1167_v41 = vpop.f32.mrb[4].mxu1 }
 0x2a6   : > { %v2157_v42 = vadd.f32 %v1167_v41, %v2150_v28  ;;  %v712_v43 = vpop.f32.mrb[5].mxu1 }
 0x2a7   : > { %v713_v44 = vadd.f32 %v2150_v28, %v712_v43  ;;  %v1168_v45 = vpop.f32.mrb[6].mxu1 }
 0x2a8   : > { %v781_v46 = vmul.f32 0.70710677, %v2157_v42  ;;  %v2162_v47 = vadd.f32 %v1168_v45, %v2150_v28  ;;  %v715_v48 = vpop.f32.mrb[7].mxu1  ;;  %v765_v37 = vmul.f32 0.5, %v2157_v42 }
 0x2a9   : > { %v779_v49 = vmul.f32 0.70710677, %v713_v44  ;;  %v2165_v50 = vadd.f32 %v2150_v28, %v715_v48  ;;  %v763_v39 = vmul.f32 0.5, %v713_v44 }
 0x2aa   : > { %1368 = verf.f32 %v781_v46  ;;  %v782_v51 = vmul.f32 0.70710677, %v2162_v47  ;;  %v766_v5 = vmul.f32 0.5, %v2162_v47 }
 0x2ab   : > { %1370 = verf.f32 %v779_v49  ;;  %v780_v52 = vmul.f32 0.70710677, %v2165_v50 }
 0x2ac   : > { %v1361_v53 = vpop.eup %1360  ;;  %1372 = verf.f32 %v782_v51 }
 0x2ad   : > { %v1363_v56 = vpop.eup %1362  ;;  %v809_v58 = vadd.f32 1.0, %v1361_v53  ;;  %1374 = verf.f32 %v780_v52  ;;  %v1171_v60 = vpop.f32.mrb[8].mxu1  ;;  %v764_v53 = vmul.f32 0.5, %v2165_v50 }
 0x2ae   : > { %v1365_v61 = vpop.eup %1364  ;;  %v807_v63 = vadd.f32 1.0, %v1363_v56  ;;  %v2175_v2 = vadd.f32 %v1171_v60, %v2150_v28  ;;  %v728_v10 = vpop.f32.mrb[9].mxu1 }
 0x2af   : > { %v1367_v12 = vpop.eup %1366  ;;  %v825_v1 = vmul.f32 %v809_v58, %v761_v57  ;;  %v810_v14 = vadd.f32 1.0, %v1365_v61  ;;  %v2178_v15 = vadd.f32 %v2150_v28, %v728_v10  ;;  %v1172_v16 = vpop.f32.mrb[10].mxu1 }
 0x2b0   : > { %v823_v17 = vmul.f32 %v807_v63, %v759_v62  ;;  %v808_v19 = vadd.f32 1.0, %v1367_v12  ;;  %v785_v20 = vmul.f32 0.70710677, %v2175_v2  ;;  %v731_v21 = vpop.f32.mrb[11].mxu1  ;;  %v2184_v26 = vadd.f32 %v1172_v16, %v2150_v28 }
 0x2b1   : > { %v857_v3 = vadd.f32 %v841_v59, %v825_v1  ;;  %v826_v22 = vmul.f32 %v810_v14, %v762_v13  ;;  %v783_v23 = vmul.f32 0.70710677, %v2178_v15  ;;  %v2194_v30 = vadd.f32 %v2150_v28, %v731_v21 }
 0x2b2   : > { %v855_v24 = vadd.f32 %v839_v54, %v823_v17  ;;  %v824_v25 = vmul.f32 %v808_v19, %v760_v18  ;;  %1376 = verf.f32 %v785_v20  ;;  %v786_v35 = vmul.f32 0.70710677, %v2184_v26 }
 0x2b3   : > { %873 = vst.msk [vmem:[%s2188_s21 + $0x10] sm:$0xff] %vm457_vm0, %v857_v3  ;;  %v858_v27 = vadd.f32 %v842_v0, %v826_v22  ;;  %1378 = verf.f32 %v783_v23  ;;  %v784_v40 = vmul.f32 0.70710677, %v2194_v30  ;;  %v769_v1 = vmul.f32 0.5, %v2175_v2 }
 0x2b4   : > { %v1369_v31 = vpop.eup %1368  ;;  %871 = vst.msk [vmem:[%s2188_s21] sm:$0xff] %vm457_vm0, %v855_v24  ;;  %v856_v32 = vadd.f32 %v840_v55, %v824_v25  ;;  %1380 = verf.f32 %v786_v35  ;;  %v849_v14 = vunpack.c.l.bf16 %v2109_v7  ;;  %v767_v17 = vmul.f32 0.5, %v2178_v15 }
 0x2b5   : > { %v1371_v36 = vpop.eup %1370  ;;  %874 = vst.msk [vmem:[%s2188_s21 + $0x18] sm:$0xff] %vm457_vm0, %v858_v27  ;;  %v813_v38 = vadd.f32 1.0, %v1369_v31  ;;  %v1175_v41 = vpop.f32.mrb[12].mxu1  ;;  %1382 = verf.f32 %v784_v40  ;;  %v770_v22 = vmul.f32 0.5, %v2184_v26  ;;  %v850_v23 = vunpack.c.h.bf16 %v2109_v7 }
 0x2b6   : > { %v1373_v43 = vpop.eup %1372  ;;  %872 = vst.msk [vmem:[%s2188_s21 + $0x8] sm:$0xff] %vm457_vm0, %v856_v32  ;;  %v811_v45 = vadd.f32 1.0, %v1371_v36  ;;  %v753_v4 = vadd.f32 %v1175_v41, %v2150_v28  ;;  %v744_v46 = vpop.f32.mrb[13].mxu1  ;;  %v768_v24 = vmul.f32 0.5, %v2194_v30  ;;  %v848_v27 = vunpack.c.h.bf16 %v2102_v6 }
 0x2b7   : > { %v1375_v48 = vpop.eup %1374  ;;  %v829_v49 = vmul.f32 %v813_v38, %v765_v37  ;;  %v814_v51 = vadd.f32 1.0, %v1373_v43  ;;  %v745_v42 = vadd.f32 %v2150_v28, %v744_v46  ;;  %v1176_v44 = vpop.f32.mrb[14].mxu1  ;;  %v853_v30 = vunpack.c.l.bf16 %v2119_v9 }
 0x2b8   : > { %v827_v52 = vmul.f32 %v811_v45, %v763_v39  ;;  %v812_v54 = vadd.f32 1.0, %v1375_v48  ;;  %v789_v55 = vmul.f32 0.70710677, %v753_v4  ;;  %v747_v56 = vpop.f32.mrb[15].mxu1  ;;  %v756_v61 = vadd.f32 %v1176_v44, %v2150_v28 }
 0x2b9   : > { %v861_v47 = vadd.f32 %v845_v11, %v829_v49  ;;  %v830_v57 = vmul.f32 %v814_v51, %v766_v5  ;;  %v787_v58 = vmul.f32 0.70710677, %v745_v42  ;;  %v748_v50 = vadd.f32 %v2150_v28, %v747_v56 }
 0x2ba   : > { %v859_v59 = vadd.f32 %v843_v29, %v827_v52  ;;  %v828_v60 = vmul.f32 %v812_v54, %v764_v53  ;;  %1384 = verf.f32 %v789_v55  ;;  %v790_v10 = vmul.f32 0.70710677, %v756_v61 }
 0x2bb   : > { %877 = vst.msk [vmem:[%s2188_s21 + $0x30] sm:$0xff] %vm457_vm0, %v861_v47  ;;  %v862_v62 = vadd.f32 %v846_v33, %v830_v57  ;;  %1386 = verf.f32 %v787_v58  ;;  %v788_v16 = vmul.f32 0.70710677, %v748_v50  ;;  %v847_v28 = vunpack.c.l.bf16 %v2102_v6 }
 0x2bc   : > { %v1377_v63 = vpop.eup %1376  ;;  %875 = vst.msk [vmem:[%s2188_s21 + $0x20] sm:$0xff] %vm457_vm0, %v859_v59  ;;  %v860_v0 = vadd.f32 %v844_v34, %v828_v60  ;;  %1388 = verf.f32 %v790_v10  ;;  %v773_v7 = vmul.f32 0.5, %v753_v4  ;;  %v771_v36 = vmul.f32 0.5, %v745_v42 }
 0x2bd   : > { %v1379_v12 = vpop.eup %1378  ;;  %878 = vst.msk [vmem:[%s2188_s21 + $0x38] sm:$0xff] %vm457_vm0, %v862_v62  ;;  %v817_v13 = vadd.f32 1.0, %v1377_v63  ;;  %1390 = verf.f32 %v788_v16  ;;  %v851_v37 = vunpack.c.l.bf16 %v2112_v8  ;;  %v774_v45 = vmul.f32 0.5, %v756_v61 }
 0x2be   : > { %876 = vst.msk [vmem:[%s2188_s21 + $0x28] sm:$0xff] %vm457_vm0, %v860_v0  ;;  %v815_v18 = vadd.f32 1.0, %v1379_v12  ;;  %v1381_v20 = vpop.eup %1380  ;;  %v854_v4 = vunpack.c.h.bf16 %v2119_v9  ;;  %v772_v48 = vmul.f32 0.5, %v748_v50  ;;  %v852_v51 = vunpack.c.h.bf16 %v2112_v8 }
 0x2bf   : > { %v833_v19 = vmul.f32 %v817_v13, %v769_v1  ;;  %v1383_v2 = vpop.eup %1382  ;;  %v818_v11 = vadd.f32 1.0, %v1381_v20 }
 0x2c0   : > { %v831_v21 = vmul.f32 %v815_v18, %v767_v17  ;;  %v816_v25 = vadd.f32 1.0, %v1383_v2 }
 0x2c1   : > { %v865_v3 = vadd.f32 %v849_v14, %v833_v19  ;;  %v834_v29 = vmul.f32 %v818_v11, %v770_v22 }
 0x2c2   : > { %v863_v15 = vadd.f32 %v847_v28, %v831_v21  ;;  %v832_v32 = vmul.f32 %v816_v25, %v768_v24 }
 0x2c3   : > { %881 = vst.msk [vmem:[%s2188_s21 + $0x50] sm:$0xff] %vm457_vm0, %v865_v3  ;;  %v866_v33 = vadd.f32 %v850_v23, %v834_v29 }
 0x2c4   : > { %v1385_v31 = vpop.eup %1384  ;;  %879 = vst.msk [vmem:[%s2188_s21 + $0x40] sm:$0xff] %vm457_vm0, %v863_v15  ;;  %v864_v35 = vadd.f32 %v848_v27, %v832_v32 }
 0x2c5   : > { %v1387_v26 = vpop.eup %1386  ;;  %v821_v34 = vadd.f32 1.0, %v1385_v31  ;;  %882 = vst.msk [vmem:[%s2188_s21 + $0x58] sm:$0xff] %vm457_vm0, %v866_v33 }
 0x2c6   : > { %v819_v6 = vadd.f32 1.0, %v1387_v26  ;;  %v1389_v39 = vpop.eup %1388  ;;  %880 = vst.msk [vmem:[%s2188_s21 + $0x48] sm:$0xff] %vm457_vm0, %v864_v35 }
 0x2c7   : > { %v837_v38 = vmul.f32 %v821_v34, %v773_v7  ;;  %v1391_v41 = vpop.eup %1390  ;;  %v822_v5 = vadd.f32 1.0, %v1389_v39 }
 0x2c8   : > { %v835_v40 = vmul.f32 %v819_v6, %v771_v36  ;;  %v820_v49 = vadd.f32 1.0, %v1391_v41 }
 0x2c9   : > { %v869_v43 = vadd.f32 %v853_v30, %v837_v38  ;;  %v838_v42 = vmul.f32 %v822_v5, %v774_v45 }
 0x2ca   : > { %v867_v46 = vadd.f32 %v851_v37, %v835_v40  ;;  %v836_v44 = vmul.f32 %v820_v49, %v772_v48 }
 0x2cb   : > { %885 = vst.msk [vmem:[%s2188_s21 + $0x70] sm:$0xff] %vm457_vm0, %v869_v43  ;;  %v870_v52 = vadd.f32 %v854_v4, %v838_v42 }
 0x2cc   : > { %883 = vst.msk [vmem:[%s2188_s21 + $0x60] sm:$0xff] %vm457_vm0, %v867_v46  ;;  %v868_v8 = vadd.f32 %v852_v51, %v836_v44 }
 0x2cd   : > { %886 = vst.msk [vmem:[%s2188_s21 + $0x78] sm:$0xff] %vm457_vm0, %v870_v52 }
 0x2ce   : > { %884 = vst.msk [vmem:[%s2188_s21 + $0x68] sm:$0xff] %vm457_vm0, %v868_v8 }
 0x2cf   : > { %1553 = shalt.err (!%p1550_p4)
}
 0x2d0   : > { %s1554_s8 = scalar_lea.hbm %s2251_s13, 2048  ;;  %s1558_s21 = scalar_lea.hbm %s2410_s14, 8192 }
 0x2d1   : > { %p1555_p3 = scmp.ne.s32.totalorder %s2251_s13, %s1554_s8  ;;  %p1559_p10 = scmp.lt.u32.totalorder %s2251_s13, %s2410_s14 }
 0x2d2   : > { %p1560_p13 = scmp.lt.u32.totalorder %s1558_s21, %s1554_s8  ;;  %p1562_p6 = scmp.lt.u32.totalorder %s1554_s8, %s2251_s13 }
 0x2d3   : > { %p1556_p12 = pnand %p1555_p3, %p2411_p2 }
 0x2d4   : > { %p1561_p8 = por %p1560_p13, %p1559_p10 }
 0x2d5   : > { %p1557_p7 = pneg %p1556_p12 }
 0x2d6   : > { %p1563_p9 = por %p1562_p6, %p1561_p8 }
 0x2d8   : > { %p1564_p11 = pnand %p1563_p9, %p1557_p7 }
 0x2da   : > { %1567 = shalt.err (!%p1564_p11)
}
 0x2db   : > { %s1684_s26 = smov 128   ;;  %s1685_s30 = smov 8  }
 0x2dc   : > { %1190 = dma.vmem_to_hbm [thread:$0]  (%p2411_p2), %s2253_s9, 2048, %s2251_s13, %s888_s12, %s1684_s26, %s1684_s26, %s1685_s30  }
 0x2dd PF: > { %s2412_s5 = sld [smem:[#allocation18_spill]]  ;;  %s2413_s11 = sld [smem:[#allocation27_spill]] }
 0x2de   : > { %p1216_p5 = scmp.ge.s32.totalorder %s1674_s28, 2 }
 0x2e3   : > { %s918_s15 = sand.u32 1, %s2412_s5   ;;  %p2414_p0 = scmp.ne.s32.totalorder %s2413_s11, 0 }
 0x2e4   : > { %s919_s1 = scalar_lea.sflag [#allocation4], %s918_s15 }
 0x2e5   : > { %p1210_p1 = pnand %p1216_p5, %p2414_p0 }
 0x2e7   : > { %1629 = dma.done.wait (!%p1210_p1), %s919_s1, 2048  }
 0x2e8   : > { %1631 = vsyncadd (!%p1210_p1), %s919_s1, 4294965248  ;;  %s27_s28 = sadd.s32 1, %s1674_s28   ;;  %s2415_s18 = sld [smem:[#allocation17_spill]] }
 0x2e9   : > { %p24_p4 = scmp.ge.s32.totalorder %s27_s28, 6   ;;  %s2416_s21 = sld [smem:[#allocation19_spill]] }
 0x2ea   : > { %s2417_s24 = sld [smem:[#allocation22_spill]]  ;;  %s2418_s26 = sld [smem:[#allocation28_spill]] }
 0x2eb   : > { %s2419_s6 = sld [smem:[#allocation29_spill]]  ;;  %s2420_s19 = smov %s1642_s20 }
 0x2ec   : > { %s2421_s20 = smov %s1944_s29  ;;  %s2422_s22 = smov %s1654_s23 }
 0x2ed   : > { %s2423_s23 = smov %s1947_s17  ;;  %s2424_s25 = smov %s1670_s27 }
 0x2ee   :  { %26 = sbr.rel (!%p24_p4) target bundleno = 17 (0x11), region = 126 }
 0x2f1   : > { %s2425_s27 = smov %s2419_s6 }
 0x2f5   :  { %924 = vsyncpa [#allocation3], 1 }
 0x2f6   :  { %926 = vsyncpa [#allocation3 + $0x1], 1 }
 0x2f7   :  { %927 = vsyncpa [#allocation6], 1 }
 0x2f8   :  { %929 = vsyncpa [#allocation6 + $0x1], 1 }
 0x2f9   :  { %930 = vsyncpa [#allocation9], 1 }
 0x2fa   :  { %932 = vsyncpa [#allocation9 + $0x1], 1 }
 0x2fb   :  { %933 = vsyncpa [#allocation4], 1 }
 0x2fc   :  { %935 = vsyncpa [#allocation4 + $0x1], 1 }

// kernel: _lambda_.2
= control target key start
LH: loop header
LB: loop body
LE: loop exit
PB: predicated region body
PF: predicated region fallthrough
CT: control target
= control target key end

     0   :  { %s2446_s0 = inlined_call_operand.hbm [shape: bf16[2,256,64], index: 0, kind: input, shape index: {}]   ;;  %s2447_s1 = inlined_call_operand.hbm [shape: bf16[2,16,64], index: 1, kind: input, shape index: {}]   ;;  %s2448_s2 = inlined_call_operand.hbm [shape: f32[2,16,1], index: 2, kind: input, shape index: {}]   ;;  %s2449_s3 = inlined_call_operand.hbm [shape: bf16[64,64], index: 3, kind: input, shape index: {}]   ;;  %s2450_s4 = inlined_call_operand.hbm [shape: f32[1,64], index: 4, kind: input, shape index: {}]   ;;  %s2451_s5 = inlined_call_operand.hbm [shape: bf16[64,64], index: 5, kind: input, shape index: {}]   ;;  %s2452_s6 = inlined_call_operand.hbm [shape: bf16[2,16,64], index: 6, kind: output, shape index: {0}]   ;;  %s2453_s7 = inlined_call_operand.hbm [shape: f32[2,16,1], index: 7, kind: output, shape index: {1}]  }
   0x1   :  { %2486 = sst [smem:[#allocation37_spill]] %s2447_s1 }
   0x2   :  { %2487 = sst [smem:[#allocation38_spill]] %s2449_s3 }
   0x3   :  { %2488 = sst [smem:[#allocation39_spill]] %s2450_s4 }
   0x4   :  { %2489 = sst [smem:[#allocation40_spill]] %s2451_s5 }
   0x5   :  { %2490 = sst [smem:[#allocation41_spill]] %s2452_s6 }
   0x6   :  { %2491 = sst [smem:[#allocation42_spill]] %s2453_s7 }
   0x7   :  { %13 = vsyncpa [#allocation6], 0 }
   0x8   :  { %15 = vsyncpa [#allocation6 + $0x1], 0 }
   0x9   :  { %16 = vsyncpa [#allocation9], 0 }
   0xa   :  { %18 = vsyncpa [#allocation9 + $0x1], 0 }
   0xb   :  { %19 = vsyncpa [#allocation12], 0 }
   0xc   :  { %20 = vsyncpa [#allocation15], 0 }
   0xd   :  { %21 = vsyncpa [#allocation7], 0 }
   0xe   :  { %23 = vsyncpa [#allocation7 + $0x1], 0 }
   0xf   :  { %24 = vsyncpa [#allocation18], 0 }
  0x10   :  { %26 = vsyncpa [#allocation18 + $0x1], 0  ;;  %s1931_s24 = smov 0   ;;  %s1933_s25 = smov 0  }
  0x11   :  { %s1935_s26 = smov 0   ;;  %s1937_s27 = smov 0  }
  0x12   :  { %s1939_s28 = smov 0   ;;  %s1941_s29 = smov 0  }
  0x13   :  { %s1943_s30 = smov 0   ;;  %s1945_s8 = smov 0  }
  0x14   :  { %s1947_s9 = smov 0   ;;  %s1949_s10 = smov 0  }
  0x15   :  { %s1951_s11 = smov 0  }
  0x16 LB: > { %2492 = sst [smem:[#allocation25_spill]] %s1825_s24  ;;  %s1985_s12 = sadd.s32 4294967295, %s1865_s11   ;;  %s1865_s11 = sphi %s1951_s11, %s32_s11   ;;  %s1861_s10 = sphi %s1949_s10, %s2561_s10   ;;  %s1857_s9 = sphi %s1947_s9, %s2560_s9   ;;  %s1853_s8 = sphi %s1945_s8, %s2559_s8   ;;  %s1849_s30 = sphi %s1943_s30, %s2553_s30   ;;  %s1845_s29 = sphi %s1941_s29, %s2558_s29   ;;  %s1841_s28 = sphi %s1939_s28, %s2557_s28   ;;  %s1837_s27 = sphi %s1937_s27, %s2552_s27   ;;  %s1833_s26 = sphi %s1935_s26, %s2556_s26   ;;  %s1829_s25 = sphi %s1933_s25, %s2555_s25   ;;  %s1825_s24 = sphi %s1931_s24, %s2551_s24  }
  0x17   : > { %2493 = sst [smem:[#allocation26_spill]] %s1829_s25  ;;  %s1169_s13 = sadd.s32 4294967294, %s1865_s11  }
  0x18   : > { %2494 = sst [smem:[#allocation27_spill]] %s1841_s28  ;;  %p66_p0 = scmp.ne.s32.totalorder %s1841_s28, %s1837_s27 }
  0x19   : > { %2495 = sst [smem:[#allocation28_spill]] %s1849_s30  ;;  %p2456_p1 = scmp.eq.s32.totalorder %s1985_s12, 0 }
  0x1a   : > { %2496 = sst [smem:[#allocation29_spill]] %s1853_s8  ;;  %p92_p2 = scmp.ne.s32.totalorder %s1829_s25, %s1825_s24 }
  0x1b   : > { %2497 = sst [smem:[#allocation30_spill]] %s1857_s9  ;;  %p1995_p4 = por %p2456_p1, %p66_p0 }
  0x1c   : > { %2498 = sst [smem:[#allocation31_spill]] %s1985_s12  ;;  %p211_p5 = scmp.eq.s32.totalorder %s1169_s13, 3 }
  0x1d   : > { %s2499_s14 = scalar_select %p1995_p4, 1, 0 }
  0x1e   : > { %p2001_p6 = por %p92_p2, %p2456_p1  ;;  %p1170_p7 = scmp.ge.s32.totalorder %s1865_s11, 1 }
  0x1f   : > { %2500 = sst [smem:[#allocation32_spill]] %s2499_s14  ;;  %p2006_p8 = por %p211_p5, %p92_p2 }
  0x20   : > { %s2501_s15 = scalar_select %p2001_p6, 1, 0 }
  0x21   : > { %s2503_s16 = scalar_select %p2006_p8, 1, 0 }
  0x22   : > { %2502 = sst [smem:[#allocation33_spill]] %s2501_s15  ;;  %p244_p9 = scmp.lt.s32.totalorder %s1865_s11, 5 }
  0x23   : > { %2504 = sst [smem:[#allocation34_spill]] %s2503_s16  ;;  %s1867_s18 = smov [#allocation11]  }
  0x24   : > { %p2011_p10 = pnand %p1170_p7, %p244_p9  ;;  %s256_s19 = sshll.u32 %s1867_s18, 4  ;;  %s257_s19 = int_to_ptr.vmem [resolvable:$true] %s256_s19 }
  0x25   : > { %s2507_s3 = sld [smem:[#allocation38_spill]] }
  0x26   : > { %s2505_s17 = scalar_select %p2011_p10, 1, 0 }
  0x27   : > { %p1347_p11 = pneg %p2011_p10 }
  0x29   : > { %p2019_p12 = pnand %p1347_p11, %p2456_p1 }
  0x2b   : > { %s2506_s20 = scalar_select %p2019_p12, 1, 0 }
  0x2c   : > { %s1525_s23 = scalar_lea.hbm %s2507_s3, 512  ;;  %p2032_p2 = pneg %p2019_p12 }
  0x2d   : > { %p1526_p0 = scmp.ne.s32.totalorder %s2507_s3, %s1525_s23  ;;  %p1532_p9 = scmp.lt.u32.totalorder %s1525_s23, %s2507_s3 }
  0x2f   : > { %p1528_p5 = pnand %p2032_p2, %p1526_p0 }
  0x31   : > { %p1529_p7 = pneg %p1528_p5 }
  0x33   : > { %p1534_p11 = pnand %p1532_p9, %p1529_p7 }
  0x35   : > { %1537 = shalt.err (!%p1534_p11)
}
  0x36   : > { %s1538_s21 = scalar_lea.vmem %s257_s19, 512  ;;  %p1546_p8 = scmp.lt.s32.totalorder %s257_s19, %s257_s19 }
  0x37   : > { %p1539_p1 = scmp.ne.s32.totalorder %s257_s19, %s1538_s21  ;;  %p1547_p6 = scmp.lt.s32.totalorder %s1538_s21, %s1538_s21 }
  0x39   : > { %p1541_p3 = pnand %p1539_p1, %p2032_p2  ;;  %p1548_p4 = por %p1547_p6, %p1546_p8 }
  0x3b   : > { %p1542_p13 = pneg %p1541_p3 }
  0x3d   : > { %p1549_p10 = pnand %p1548_p4, %p1542_p13 }
  0x3f   : > { %1552 = shalt.err (!%p1549_p10)
}
  0x40   : > { %s2467_s22 = smov 64   ;;  %s2469_s24 = smov 4  }
  0x41   : > { %1350 = dma.hbm_to_vmem [thread:$0]  (!%p2019_p12), %s2507_s3, 512, %s257_s19, [#allocation12], %s2467_s22, %s2467_s22, %s2469_s24  }
  0x42   : > { %p86_p1 = scmp.ne.s32.totalorder %s1833_s26, %s1829_s25  ;;  %p2471_p3 = scmp.lt.s32.totalorder %s1865_s11, 4 }
  0x43   : > { %s317_s13 = sand.u32 1, %s1865_s11   ;;  %p2509_p4 = scmp.eq.s32.totalorder %s1865_s11, 0 }
  0x44   : > { %p2510_p8 = scmp.eq.s32.totalorder %s1985_s12, 3  ;;  %s319_s7 = sand.u32 1, %s1833_s26  }
  0x45   : > { %p88_p6 = por %p86_p1, %p2509_p4  ;;  %s1179_s6 = sshll.u32 %s319_s7, 3 }
  0x46   : > { %p2060_p10 = por %p2510_p8, %p86_p1  ;;  %s1227_s8 = sshll.u32 %s1861_s10, 7 }
  0x47   : > { %s2513_s1 = sld [smem:[#allocation37_spill]]  ;;  %s321_s19 = scalar_lea.vmem [#allocation8], %s1179_s6 }
  0x48   : > { %s2511_s21 = scalar_select %p2060_p10, 1, 0 }
  0x49   : > { %s328_s16 = sshll.u32 %s321_s19, 4  ;;  %p2073_p13 = pnand %p2471_p3, %p88_p6  ;;  %s2077_s16 = int_to_ptr.vmem [resolvable:$true] %s328_s16 }
  0x4a   : > { %2512 = sst [smem:[#allocation35_spill]] %s2511_s21  ;;  %s2079_s27 = sshll.u32 %s319_s7, 4 }
  0x4b   : > { %s2514_s23 = scalar_select %p2073_p13, 1, 0 }
  0x4c   : > { %s2081_s30 = scalar_lea.sflag [#allocation9], %s317_s13  ;;  %p2480_p5 = pneg %p2073_p13 }
  0x4d   : > { %s2069_s14 = scalar_lea.hbm %s2513_s1, %s1227_s8  ;;  %s1558_s19 = scalar_lea.hbm %s2513_s1, 256 }
  0x4e   : > { %s1553_s8 = scalar_lea.hbm %s2069_s14, 128  ;;  %p1559_p11 = scmp.lt.u32.totalorder %s2069_s14, %s2513_s1 }
  0x4f   : > { %p1554_p0 = scmp.ne.s32.totalorder %s2069_s14, %s1553_s8  ;;  %p1560_p1 = scmp.lt.u32.totalorder %s1558_s19, %s1553_s8 }
  0x50   : > { %p1562_p6 = scmp.lt.u32.totalorder %s1553_s8, %s2069_s14 }
  0x51   : > { %p1556_p7 = pnand %p2480_p5, %p1554_p0  ;;  %p1561_p4 = por %p1560_p1, %p1559_p11 }
  0x53   : > { %p1557_p9 = pneg %p1556_p7  ;;  %p1563_p8 = por %p1562_p6, %p1561_p4 }
  0x55   : > { %p1564_p3 = pnand %p1563_p8, %p1557_p9 }
  0x57   : > { %1567 = shalt.err (!%p1564_p3)
}
  0x58   : > { %s1568_s7 = scalar_lea.vmem %s2077_s16, 128  ;;  %s1870_s13 = smov [#allocation8]  }
  0x59   : > { %p1569_p0 = scmp.ne.s32.totalorder %s2077_s16, %s1568_s7  ;;  %s1573_s6 = sshll.u32 %s1870_s13, 4  ;;  %s1574_s6 = int_to_ptr.vmem [resolvable:$false] %s1573_s6 }
  0x5a   : > { %s1575_s22 = scalar_lea.vmem %s1574_s6, 256  ;;  %p1576_p12 = scmp.lt.s32.totalorder %s2077_s16, %s1574_s6 }
  0x5b   : > { %p1571_p7 = pnand %p1569_p0, %p2480_p5  ;;  %p1577_p11 = scmp.lt.s32.totalorder %s1575_s22, %s1568_s7 }
  0x5d   : > { %p1572_p10 = pneg %p1571_p7  ;;  %p1578_p1 = por %p1577_p11, %p1576_p12 }
  0x5f   : > { %p1579_p4 = pnand %p1578_p1, %p1572_p10 }
  0x61   : > { %1582 = shalt.err (!%p1579_p4)
}
  0x62   : > { %s2515_s24 = smov 4   ;;  %s2516_s8 = smov 64  }
  0x63   : > { %1363 = dma.hbm_to_vmem [thread:$0]  (!%p2073_p13), %s2069_s14, 128, %s2077_s16, %s2081_s30, %s2516_s8, %s2516_s8, %s2515_s24  }
  0x64   : > { %s342_s15 = scalar_lea.vmem [#allocation10], %s2079_s27  ;;  %s1871_s13 = smov [#allocation13]  }
  0x65   : > { %s2113_s19 = sshll.u32 %s342_s15, 4  ;;  %s270_s6 = sshll.u32 %s1871_s13, 4  ;;  %s271_s6 = int_to_ptr.vmem [resolvable:$true] %s270_s6  ;;  %s2238_s19 = int_to_ptr.vmem [resolvable:$true] %s2113_s19 }
  0x66   : > { %s1872_s7 = smov [#allocation14]   ;;  %s2517_s4 = sld [smem:[#allocation39_spill]] }
  0x67   : > { %s280_s22 = sshll.u32 %s1872_s7, 4  ;;  %s281_s22 = int_to_ptr.vmem [resolvable:$true] %s280_s22 }
  0x6c   : > { %s1583_s21 = scalar_lea.hbm %s2517_s4, 16 }
  0x6d   : > { %p1584_p12 = scmp.ne.s32.totalorder %s2517_s4, %s1583_s21  ;;  %p1590_p9 = scmp.lt.u32.totalorder %s1583_s21, %s2517_s4 }
  0x6f   : > { %p1586_p3 = pnand %p1584_p12, %p2032_p2 }
  0x71   : > { %p1587_p10 = pneg %p1586_p3 }
  0x73   : > { %p1592_p6 = pnand %p1590_p9, %p1587_p10 }
  0x75   : > { %1595 = shalt.err (!%p1592_p6)
}
  0x76   : > { %s1596_s16 = scalar_lea.vmem %s271_s6, 16  ;;  %s1603_s1 = scalar_lea.vmem %s271_s6, 32 }
  0x77   : > { %p1597_p8 = scmp.ne.s32.totalorder %s271_s6, %s1596_s16  ;;  %p1604_p11 = scmp.lt.s32.totalorder %s271_s6, %s271_s6 }
  0x78   : > { %p1605_p1 = scmp.lt.s32.totalorder %s1603_s1, %s1596_s16 }
  0x79   : > { %p1599_p0 = pnand %p1597_p8, %p2032_p2 }
  0x7a   : > { %p1606_p4 = por %p1605_p1, %p1604_p11 }
  0x7b   : > { %p1600_p7 = pneg %p1599_p0 }
  0x7d   : > { %p1607_p5 = pnand %p1606_p4, %p1600_p7 }
  0x7f   : > { %1610 = shalt.err (!%p1607_p5)
}
  0x80   : > { %p2518_p12 = scmp.ne.s32.totalorder %s2506_s20, 0  ;;  %s2519_s5 = sld [smem:[#allocation40_spill]] }
  0x82   : > { %1353 = dma.hbm_to_vmem [thread:$0]  (!%p2518_p12), %s2517_s4, 16, %s271_s6, [#allocation12]  }
  0x86   : > { %s1611_s15 = scalar_lea.hbm %s2519_s5, 512 }
  0x87   : > { %p1612_p3 = scmp.ne.s32.totalorder %s2519_s5, %s1611_s15  ;;  %p1618_p5 = scmp.lt.u32.totalorder %s1611_s15, %s2519_s5 }
  0x89   : > { %p1614_p10 = pnand %p1612_p3, %p2032_p2 }
  0x8b   : > { %p1615_p9 = pneg %p1614_p10 }
  0x8d   : > { %p1620_p6 = pnand %p1618_p5, %p1615_p9 }
  0x8f   : > { %1623 = shalt.err (!%p1620_p6)
}
  0x90   : > { %s1624_s16 = scalar_lea.vmem %s281_s22, 512  ;;  %p1632_p11 = scmp.lt.s32.totalorder %s281_s22, %s281_s22 }
  0x91   : > { %p1625_p8 = scmp.ne.s32.totalorder %s281_s22, %s1624_s16  ;;  %p1633_p1 = scmp.lt.s32.totalorder %s1624_s16, %s1624_s16 }
  0x93   : > { %p1627_p0 = pnand %p1625_p8, %p2032_p2  ;;  %p1634_p4 = por %p1633_p1, %p1632_p11 }
  0x95   : > { %p1628_p7 = pneg %p1627_p0 }
  0x97   : > { %p1635_p13 = pnand %p1634_p4, %p1628_p7 }
  0x99   : > { %1638 = shalt.err (!%p1635_p13)
}
  0x9a   : > { %1356 = dma.hbm_to_vmem [thread:$0]  (!%p2518_p12), %s2519_s5, 512, %s281_s22, [#allocation15], %s2516_s8, %s2516_s8, %s2515_s24  }
  0x9b   : > { %s44_s18 = sadd.s32 1, %s1861_s10  ;;  %s41_s20 = sadd.s32 1, %s1857_s9 }
  0x9c   : > { %s53_s3 = sadd.s32 1, %s1845_s29  ;;  %p42_p2 = scmp.ge.s32.totalorder %s41_s20, 2 }
  0x9d   : > { %p60_p13 = scmp.ne.s32.totalorder %s1845_s29, %s1841_s28  ;;  %s294_s25 = sand.u32 1, %s1845_s29  }
  0x9e   : > { %s1176_s12 = sshll.u32 %s1857_s9, 4  ;;  %s2563_s20 = smov (%p42_p2, %s41_s20), 0 }
  0x9f   : > { %2520 = sst [smem:[#allocation36_spill]] %s2563_s20  ;;  %s2565_s18 = smov (!%p42_p2, %s44_s18), %s1861_s10 }
  0xa0   : > { %s49_s21 = ssub.s32 %s1857_s9, %s2563_s20  ;;  %p2521_p3 = scmp.eq.s32.totalorder %s1865_s11, 0 }
  0xa1   : > { %p46_p12 = scmp.ge.s32.totalorder %s2565_s18, 2  ;;  %s1175_s22 = sshll.u32 %s294_s25, 6 }
  0xa2   : > { %p2168_p10 = por %p2521_p3, %p60_p13  ;;  %s1177_s13 = sshll.u32 %s1861_s10, 5 }
  0xa3   : > { %s2567_s18 = smov (%p46_p12, %s2565_s18), 0  ;;  %s304_s7 = sadd.s32 %s1177_s13, %s1176_s12 }
  0xa4   : > { %s48_s14 = ssub.s32 %s1861_s10, %s2567_s18  ;;  %s1178_s27 = sshll.u32 %s304_s7, 6 }
  0xa5   : > { %s50_s16 = sor.u32 %s49_s21, %s48_s14  ;;  %p77_p9 = scmp.eq.s32.totalorder %s48_s14, 0 }
  0xa6   : > { %p51_p5 = scmp.eq.s32.totalorder %s50_s16, 0  ;;  %s2180_s4 = scalar_lea.hbm %s2446_s0, %s1178_s27 }
  0xa7   : > { %s2523_s5 = sadd.s32 1, %s1833_s26  ;;  %s298_s28 = scalar_lea.vmem [#allocation5], %s1175_s22 }
  0xa8   : > { %s2185_s20 = scalar_select %p77_p9, %s1833_s26, %s2523_s5  }
  0xa9   : > { %s2188_s9 = scalar_select %p51_p5, %s1845_s29, %s53_s3  }
  0xaa   : > { %s307_s12 = sshll.u32 %s298_s28, 4  ;;  %p2524_p6 = scmp.lt.s32.totalorder %s1865_s11, 4  ;;  %s2198_s12 = int_to_ptr.vmem [resolvable:$true] %s307_s12 }
  0xab   : > { %s1228_s13 = sshll.u32 %s1861_s10, 8  ;;  %s2206_s3 = scalar_lea.sflag [#allocation6], %s294_s25 }
  0xac   : > { %p2194_p8 = pnand %p2524_p6, %p2168_p10  ;;  %s2204_s5 = scalar_lea.hbm %s2448_s2, %s1228_s13 }
  0xad   : > { %s1639_s22 = scalar_lea.hbm %s2180_s4, 1024  ;;  %s1644_s27 = scalar_lea.hbm %s2446_s0, 4096 }
  0xae   : > { %p1640_p0 = scmp.ne.s32.totalorder %s2180_s4, %s1639_s22  ;;  %p1641_p7 = pneg %p2194_p8 }
  0xaf   : > { %p1645_p4 = scmp.lt.u32.totalorder %s2180_s4, %s2446_s0  ;;  %p1646_p2 = scmp.lt.u32.totalorder %s1644_s27, %s1639_s22 }
  0xb0   : > { %p1642_p11 = pnand %p1641_p7, %p1640_p0  ;;  %p1648_p3 = scmp.lt.u32.totalorder %s1639_s22, %s2180_s4 }
  0xb1   : > { %p1647_p13 = por %p1646_p2, %p1645_p4 }
  0xb2   : > { %p1643_p1 = pneg %p1642_p11 }
  0xb3   : > { %p1649_p10 = por %p1648_p3, %p1647_p13 }
  0xb5   : > { %p1650_p12 = pnand %p1649_p10, %p1643_p1 }
  0xb7   : > { %1653 = shalt.err (!%p1650_p12)
}
  0xb8   : > { %s1654_s25 = scalar_lea.vmem %s2198_s12, 1024  ;;  %s1873_s1 = smov [#allocation5]  }
  0xb9   : > { %p1655_p9 = scmp.ne.s32.totalorder %s2198_s12, %s1654_s25  ;;  %s1659_s13 = sshll.u32 %s1873_s1, 4  ;;  %s1660_s13 = int_to_ptr.vmem [resolvable:$false] %s1659_s13 }
  0xba   : > { %s1661_s7 = scalar_lea.vmem %s1660_s13, 2048  ;;  %p1662_p0 = scmp.lt.s32.totalorder %s2198_s12, %s1660_s13 }
  0xbb   : > { %p1657_p5 = pnand %p1655_p9, %p1641_p7  ;;  %p1663_p11 = scmp.lt.s32.totalorder %s1661_s7, %s1654_s25 }
  0xbd   : > { %p1658_p6 = pneg %p1657_p5  ;;  %p1664_p4 = por %p1663_p11, %p1662_p0 }
  0xbf   : > { %p1665_p2 = pnand %p1664_p4, %p1658_p6 }
  0xc1   : > { %1668 = shalt.err (!%p1665_p2)
}
  0xc2   : > { %1360 = dma.hbm_to_vmem [thread:$0]  (!%p2194_p8), %s2180_s4, 1024, %s2198_s12, %s2206_s3, %s2516_s8, %s2516_s8, %s2515_s24  }
  0xc3   : > { %s1669_s14 = scalar_lea.hbm %s2204_s5, 256  ;;  %p2526_p1 = scmp.ne.s32.totalorder %s2514_s23, 0 }
  0xc4   : > { %p1670_p7 = scmp.ne.s32.totalorder %s2204_s5, %s1669_s14  ;;  %s1674_s28 = scalar_lea.hbm %s2448_s2, 512 }
  0xc5   : > { %p2527_p13 = pneg %p2526_p1  ;;  %p1675_p12 = scmp.lt.u32.totalorder %s2204_s5, %s2448_s2 }
  0xc6   : > { %p1676_p9 = scmp.lt.u32.totalorder %s1674_s28, %s1669_s14  ;;  %p1678_p6 = scmp.lt.u32.totalorder %s1669_s14, %s2204_s5 }
  0xc7   : > { %p1672_p3 = pnand %p1670_p7, %p2527_p13 }
  0xc8   : > { %p1677_p5 = por %p1676_p9, %p1675_p12 }
  0xc9   : > { %p1673_p10 = pneg %p1672_p3 }
  0xca   : > { %p1679_p8 = por %p1678_p6, %p1677_p5 }
  0xcc   : > { %p1680_p0 = pnand %p1679_p8, %p1673_p10 }
  0xce   : > { %1683 = shalt.err (!%p1680_p0)
}
  0xcf   : > { %s1684_s4 = scalar_lea.vmem %s2238_s19, 256  ;;  %p2528_p4 = pmov %p2527_p13 }
  0xd0   : > { %p1685_p11 = scmp.ne.s32.totalorder %s2238_s19, %s1684_s4  ;;  %s1874_s24 = smov [#allocation10]  }
  0xd1   : > { %s1689_s8 = sshll.u32 %s1874_s24, 4  ;;  %s1690_s8 = int_to_ptr.vmem [resolvable:$false] %s1689_s8 }
  0xd2   : > { %p1687_p2 = pnand %p1685_p11, %p2528_p4  ;;  %s1691_s12 = scalar_lea.vmem %s1690_s8, 512 }
  0xd3   : > { %p1692_p13 = scmp.lt.s32.totalorder %s2238_s19, %s1690_s8  ;;  %p1693_p3 = scmp.lt.s32.totalorder %s1691_s12, %s1684_s4 }
  0xd4   : > { %p1688_p7 = pneg %p1687_p2 }
  0xd5   : > { %p1694_p12 = por %p1693_p3, %p1692_p13 }
  0xd7   : > { %p1695_p9 = pnand %p1694_p12, %p1688_p7 }
  0xd9   : > { %1698 = shalt.err (!%p1695_p9)
}
  0xda   : > { %s1875_s3 = smov 128   ;;  %s1876_s16 = smov 8  }
  0xdb   : > { %1366 = dma.hbm_to_vmem [thread:$0]  (!%p2526_p1), %s2204_s5, 256, %s2238_s19, %s2081_s30, %s1875_s3, %s1875_s3, %s1876_s16  }
  0xdc   : > { %p2529_p10 = scmp.ne.s32.totalorder %s2505_s17, 0 }
  0xdd   : > { %s2530_s6 = sld [smem:[#allocation27_spill]] (!%p2529_p10)  ;;  %s2531_s25 = sld [smem:[#allocation32_spill]] (!%p2529_p10) }
  0xde   : > { %361 = sbr.rel (%p2529_p10) target bundleno = 1637 (0x665), region = 44 }
  0xe3   : > { %s363_s1 = sand.u32 (!%p2529_p10), 1, %s2530_s6   ;;  %p2532_p5 = scmp.ne.s32.totalorder (!%p2529_p10), %s2531_s25, 0 }
  0xe4   : > { %s1186_s13 = sshll.u32 (!%p2529_p10), %s363_s1, 6  ;;  %s364_s7 = scalar_lea.sflag (!%p2529_p10), [#allocation6], %s363_s1 }
  0xe5   : > { %s2267_s14 = scalar_lea.vmem [#allocation5], %s1186_s13 }
  0xe6   : > { %1800 = dma.done.wait (%p2532_p5), %s364_s7, 1024  }
  0xe7   : > { %1802 = vsyncadd (%p2532_p5), %s364_s7, 4294966272  ;;  %s2533_s21 = sld [smem:[#allocation31_spill]]  ;;  %s2534_s22 = sld [smem:[#allocation26_spill]] }
  0xe8   : > { %s2535_s28 = sld [smem:[#allocation33_spill]] }
  0xed   : > { %s372_s23 = sand.u32 1, %s2533_s21   ;;  %s2275_s30 = sand.u32 1, %s2534_s22  }
  0xee   : > { %s1187_s17 = sshll.u32 %s2275_s30, 3  ;;  %s373_s19 = scalar_lea.sflag [#allocation9], %s372_s23 }
  0xef   : > { %s2278_s5 = scalar_lea.vmem [#allocation8], %s1187_s17  ;;  %p2536_p1 = scmp.ne.s32.totalorder %s2535_s28, 0 }
  0xf1   : > { %1804 = dma.done.wait (%p2536_p1), %s373_s19, 384  }
  0xf2   : > { %1806 = vsyncadd (%p2536_p1), %s373_s19, 4294966912  ;;  %s1188_s15 = sshll.u32 %s2275_s30, 4  ;;  %p2537_p6 = scmp.eq.s32.totalorder %s2533_s21, 0 }
  0xf3   : > { %s2285_s27 = scalar_lea.vmem [#allocation10], %s1188_s15 }
  0xf4   : > { %1808 = dma.done.wait (%p2537_p6), [#allocation12], 528   ;;  %p2538_p8 = pmov %p2537_p6 }
  0xf5   : > { %p2539_p0 = pmov %p2537_p6 }
  0xf6   : > { %1810 = vsyncadd (%p2538_p8), [#allocation12], 4294966768 }
  0xf7   : > { %1812 = dma.done.wait (%p2539_p0), [#allocation15], 512   ;;  %p2540_p11 = pmov %p2539_p0 }
  0xf8   : > { %s2295_s4 = scalar_lea.vmem [#allocation16], %s1187_s17  ;;  %s2297_s24 = scalar_lea.vmem [#allocation17], %s1188_s15 }
  0xf9   : > { %1814 = vsyncadd (%p2540_p11), [#allocation15], 4294966784  ;;  %s2541_s8 = sld [smem:[#allocation28_spill]] }
  0xff   : > { %p1194_p4 = scmp.ne.s32.totalorder %s2541_s8, 0 }
 0x100   : > { %vm449_vm0 = vcmask (!%p1194_p4), 7168   ;;  %vm454_vm1 = vcmask (!%p1194_p4), 523264   ;;  %v1877_v0 = vmov (!%p1194_p4), -inf   ;;  %v1878_v1 = vmov (!%p1194_p4), 0.0  }
 0x101   : > { %448 = sbr.rel (%p1194_p4) target bundleno = 264 (0x108), region = 72  ;;  %450 = vst.msk [vmem:[#allocation2] sm:$0xff] (!%p1194_p4), %vm449_vm0, %v1877_v0  ;;  %451 = vst.msk [vmem:[#allocation2 + $0x8] sm:$0xff] (!%p1194_p4), %vm449_vm0, %v1877_v0 }
 0x102   : > { %452 = vst.msk [vmem:[#allocation3] sm:$0xff] (!%p1194_p4), %vm449_vm0, %v1878_v1  ;;  %453 = vst.msk [vmem:[#allocation3 + $0x8] sm:$0xff] (!%p1194_p4), %vm449_vm0, %v1878_v1 }
 0x103   : > { %455 = vst.msk [vmem:[#allocation4] sm:$0xff] (!%p1194_p4), %vm454_vm1, %v1878_v1  ;;  %456 = vst.msk [vmem:[#allocation4 + $0x8] sm:$0xff] (!%p1194_p4), %vm454_vm1, %v1878_v1 }
 0x108 PF: > { %v1491_v2 = vld [vmem:[%s2267_s14] sm:$0xff]   ;;  %v1879_v3 = vmov 0.0   ;;  %vm532_vm2 = vcmask 523264   ;;  %v1492_v5 = vld [vmem:[%s2267_s14 + $0x8] sm:$0xff]   ;;  %vm1880_vm3 = vmmov 0   ;;  %v1493_v8 = vld [vmem:[%s2267_s14 + $0x10] sm:$0xff]  }
 0x109   : > { %1261 = vmatprep.subr.bf16.mxu0 %v1879_v3  ;;  %1281 = vmatprep.subr.bf16.mxu1 %v1879_v3  ;;  %v537_v4 = vsel %vm532_vm2, %v1491_v2, 0  ;;  %v540_v6 = vsel %vm532_vm2, %v1492_v5, 0  ;;  %v475_v7 = vld [vmem:[%s2285_s27] sm:$0xff]  ;;  %v1881_v9 = vmov 0   ;;  %v476_v10 = vld [vmem:[%s2285_s27 + $0x8] sm:$0xff]  ;;  %v543_v12 = vsel %vm532_vm2, %v1493_v8, 0 }
 0x10a   : > { %1282 = vmatpush3.bf16.msra.mxu1 %v1491_v2  ;;  %1262 = vmatpush3.bf16.xpose.msra.mxu0 %v537_v4  ;;  %v1494_v11 = vld [vmem:[%s2267_s14 + $0x18] sm:$0xff]   ;;  %v1495_v13 = vld [vmem:[%s2267_s14 + $0x20] sm:$0xff]   ;;  %v1496_v14 = vld [vmem:[%s2267_s14 + $0x28] sm:$0xff]   ;;  %vm641_vm4 = vcmask 7168   ;;  %s2542_s12 = sld [smem:[#allocation28_spill]] }
 0x10b   : > { %1283 = vmatprep.subr.bf16.mxu1 %v1879_v3  ;;  %1263 = vmatprep.subr.bf16.mxu0 %v1879_v3  ;;  %v546_v15 = vsel %vm532_vm2, %v1494_v11, 0  ;;  %v1497_v16 = vld [vmem:[%s2267_s14 + $0x30] sm:$0xff]   ;;  %v1498_v17 = vld [vmem:[%s2267_s14 + $0x38] sm:$0xff]   ;;  %v549_v18 = vsel %vm532_vm2, %v1495_v13, 0  ;;  %v552_v19 = vsel %vm532_vm2, %v1496_v14, 0  ;;  %v1499_v22 = vld [vmem:[%s2278_s5] sm:$0xff]  }
 0x10c   : > { %1277 = vmatprep.mubr.msk.bf16.mxu0 %vm1880_vm3, %v1879_v3  ;;  %1297 = vmatprep.mubr.msk.bf16.mxu1 %vm1880_vm3, %v1879_v3  ;;  %v555_v20 = vsel %vm532_vm2, %v1497_v16, 0  ;;  %v558_v21 = vsel %vm532_vm2, %v1498_v17, 0  ;;  %v601_v31 = vld [vmem:[#allocation2] sm:$0xff]  ;;  %v602_v34 = vld [vmem:[#allocation2 + $0x8] sm:$0xff]  ;;  %v631_v52 = vld [vmem:[#allocation3] sm:$0xff] }
 0x10d   : > { %1489 = vset.pattern.permute.xlu0 %v1881_v9  ;;  %1490 = vset.pattern.permute.xlu1 %v1881_v9  ;;  %v632_v55 = vld [vmem:[#allocation3 + $0x8] sm:$0xff]  ;;  %v644_v60 = vld [vmem:[#allocation4] sm:$0xff]  ;;  %v645_v62 = vld [vmem:[#allocation4 + $0x8] sm:$0xff] }
 0x10e   : > { %1284 = vmatpush3.bf16.msra.mxu1 %v1492_v5  ;;  %479 = vperm.xlu0 %1489, %v475_v7  }
 0x10f   : > { %1285 = vmatprep.subr.bf16.mxu1 %v1879_v3 }
 0x110   : > { %p1205_p2 = scmp.ne.s32.totalorder %s2542_s12, 1 }
 0x111   : > { %vm1884_vm5 = vmmov (!%p1205_p2), 0   ;;  %vm935_vm6 = vcmask (!%p1205_p2), 519168  }
 0x112   : > { %1264 = vmatpush3.bf16.xpose.msra.mxu0 %v540_v6  ;;  %1286 = vmatpush3.bf16.msra.mxu1 %v1493_v8 }
 0x113   : > { %1265 = vmatprep.subr.bf16.mxu0 %v1879_v3  ;;  %1287 = vmatprep.subr.bf16.mxu1 %v1879_v3 }
 0x114   : > { %484 = vperm.xlu0 %1489, %v476_v10   ;;  %v1882_v10 = vmov (!%p1205_p2), 0  }
 0x116   : > { %1288 = vmatpush3.bf16.msra.mxu1 %v1494_v11  ;;  %v1883_v11 = vmov (!%p1205_p2), 0.0  }
 0x117   : > { %1289 = vmatprep.subr.bf16.mxu1 %v1879_v3 }
 0x11a   : > { %1266 = vmatpush3.bf16.xpose.msra.mxu0 %v543_v12  ;;  %1290 = vmatpush3.bf16.msra.mxu1 %v1495_v13  ;;  %v1509_v12 = vld [vmem:[#allocation11] sm:$0xff] (!%p1205_p2)  }
 0x11b   : > { %1267 = vmatprep.subr.bf16.mxu0 %v1879_v3  ;;  %1291 = vmatprep.subr.bf16.mxu1 %v1879_v3  ;;  %v778_v13 = vsel (!%p1205_p2), %vm532_vm2, %v1509_v12, 0 }
 0x11e   : > { %1292 = vmatpush3.bf16.msra.mxu1 %v1496_v14  ;;  %v1510_v14 = vld [vmem:[#allocation11 + $0x8] sm:$0xff] (!%p1205_p2)  }
 0x11f   : > { %1293 = vmatprep.subr.bf16.mxu1 %v1879_v3 }
 0x122   : > { %1268 = vmatpush3.bf16.xpose.msra.mxu0 %v546_v15  ;;  %1294 = vmatpush3.bf16.msra.mxu1 %v1497_v16  ;;  %v781_v15 = vsel (!%p1205_p2), %vm532_vm2, %v1510_v14, 0 }
 0x123   : > { %1269 = vmatprep.subr.bf16.mxu0 %v1879_v3  ;;  %1295 = vmatprep.subr.bf16.mxu1 %v1879_v3 }
 0x126   : > { %1296 = vmatpush3.bf16.msra.mxu1 %v1498_v17 }
 0x127   : > { %1313 = vmatprep.subr.bf16.mxu1 (!%p1205_p2), %v1883_v11 }
 0x12a   : > { %1270 = vmatpush3.bf16.xpose.msra.mxu0 %v549_v18  ;;  %v1511_v18 = vld [vmem:[#allocation11 + $0x10] sm:$0xff] (!%p1205_p2)  }
 0x12b   : > { %1271 = vmatprep.subr.bf16.mxu0 %v1879_v3 }
 0x132   : > { %1272 = vmatpush3.bf16.xpose.msra.mxu0 %v552_v19  ;;  %v784_v19 = vsel (!%p1205_p2), %vm532_vm2, %v1511_v18, 0 }
 0x133   : > { %1273 = vmatprep.subr.bf16.mxu0 %v1879_v3 }
 0x13a   : > { %1274 = vmatpush3.bf16.xpose.msra.mxu0 %v555_v20  ;;  %v1513_v20 = vld [vmem:[#allocation14] sm:$0xff] (!%p1205_p2)  }
 0x13b   : > { %1275 = vmatprep.subr.bf16.mxu0 %v1879_v3 }
 0x142   : > { %1276 = vmatpush3.bf16.xpose.msra.mxu0 %v558_v21  ;;  %v1512_v21 = vld [vmem:[#allocation11 + $0x18] sm:$0xff] (!%p1205_p2)  }
 0x143   : > { %1301 = vmatprep.subr.bf16.mxu0 (!%p1205_p2), %v1883_v11 }
 0x149   : > { %1278 = vmatmul.mubr.msk.bf16.vlgmr.msra.gmra.mrb[0].mxu0 %vm532_vm2, %v1499_v22  ;;  %v873_v22 = vsel (!%p1205_p2), %vm532_vm2, %v1513_v20, 0 }
 0x14a   : > { %1302 = vmatpush3.bf16.xpose.msra.mxu0 (!%p1205_p2), %v778_v13  ;;  %1309 = vmatprep.mubr.msk.bf16.mxu0 (!%p1205_p2), %vm1884_vm5, %v1883_v11 }
 0x14b   : > { %1303 = vmatprep.subr.bf16.mxu0 (!%p1205_p2), %v1883_v11 }
 0x152   : > { %1304 = vmatpush3.bf16.xpose.msra.mxu0 (!%p1205_p2), %v781_v15 }
 0x153   : > { %1305 = vmatprep.subr.bf16.mxu0 (!%p1205_p2), %v1883_v11 }
 0x15a   : > { %1306 = vmatpush3.bf16.xpose.msra.mxu0 (!%p1205_p2), %v784_v19 }
 0x15b   : > { %1307 = vmatprep.subr.bf16.mxu0 (!%p1205_p2), %v1883_v11 }
 0x18d   : > { %v480_v23 = vpop.permute.xlu0 %479 }
 0x193   : > { %v485_v29 = vpop.permute.xlu0 %484 }
 0x21c   : > { %v594_v24 = vpop.f32.mrb[0].mxu0 }
 0x21d   : > { %v595_v25 = vadd.f32 %v594_v24, %v480_v23  ;;  %v1279_v26 = vpop.f32.mrb[1].mxu0  ;;  %v787_v23 = vsel (!%p1205_p2), %vm532_vm2, %v1512_v21, 0 }
 0x21e   : > { %v597_v27 = vpop.f32.mrb[2].mxu0  ;;  %1308 = vmatpush3.bf16.xpose.msra.mxu0 (!%p1205_p2), %v787_v23 }
 0x21f   : > { %603 = vmax.xlane.f32.xlu1 %v595_v25  ;;  %v1280_v28 = vpop.f32.mrb[3].mxu0  ;;  %v598_v30 = vadd.f32 %v597_v27, %v485_v29 }
 0x223   : > { %605 = vmax.xlane.f32.xlu1 %v598_v30 }
 0x2ac   : > { %v604_v32 = vpop.xlane.xlu1 %603 }
 0x2ad   : > { %v607_v33 = vmax.f32 %v601_v31, %v604_v32 }
 0x2af   : > { %v609_v35 = vsub.f32 %v601_v31, %v607_v33  ;;  %712 = vst.msk [vmem:[#allocation2] sm:$0xff] %vm641_vm4, %v607_v33  ;;  %617 = vperm.xlu0 %1489, %v607_v33   ;;  %v1514_v31 = vld [vmem:[#allocation14 + $0x8] sm:$0xff] (!%p1205_p2)   ;;  %v1515_v33 = vld [vmem:[#allocation14 + $0x10] sm:$0xff] (!%p1205_p2)  }
 0x2b0   : > { %v606_v36 = vpop.xlane.xlu1 %605  ;;  %v876_v32 = vsel (!%p1205_p2), %vm532_vm2, %v1514_v31, 0 }
 0x2b1   : > { %v608_v37 = vmax.f32 %v602_v34, %v606_v36  ;;  %v611_v49 = vmul.f32 1.442695, %v609_v35  ;;  %v1516_v35 = vld [vmem:[#allocation14 + $0x18] sm:$0xff] (!%p1205_p2)  }
 0x2b2   : > { %v882_v36 = vsel (!%p1205_p2), %vm532_vm2, %v1516_v35, 0 }
 0x2b3   : > { %v610_v38 = vsub.f32 %v602_v34, %v608_v37  ;;  %713 = vst.msk [vmem:[#allocation2 + $0x8] sm:$0xff] %vm641_vm4, %v608_v37  ;;  %622 = vperm.xlu1 %1490, %v608_v37   ;;  %v879_v34 = vsel (!%p1205_p2), %vm532_vm2, %v1515_v33, 0  ;;  %v1206_v37 = vld [vmem:[#allocation13] ss:$0 sm:$0xff] (!%p1205_p2) }
 0x2b5   : > { %v613_v48 = vmul.f32 1.442695, %v610_v38 }
 0x32e   : > { %v618_v39 = vpop.permute.xlu0 %617 }
 0x32f   : > { %v625_v40 = vsub.f32 %v595_v25, %v618_v39 }
 0x331   : > { %v627_v41 = vmul.f32 1.442695, %v625_v40 }
 0x332   : > { %v623_v42 = vpop.permute.xlu1 %622 }
 0x333   : > { %1500 = vpow2.f32 %v627_v41  ;;  %v626_v43 = vsub.f32 %v598_v30, %v623_v42 }
 0x335   : > { %v629_v44 = vmul.f32 1.442695, %v626_v43 }
 0x337   : > { %1502 = vpow2.f32 %v629_v44 }
 0x338   : > { %1504 = vpow2.f32 %v613_v48 }
 0x339   : > { %1506 = vpow2.f32 %v611_v49 }
 0x33d   : > { %v1501_v45 = vpop.eup %1500 }
 0x33e   : > { %635 = vadd.xlane.f32.xlu0 %v1501_v45 }
 0x341   : > { %v1503_v46 = vpop.eup %1502 }
 0x342   : > { %637 = vadd.xlane.f32.xlu1 %v1503_v46  ;;  %v658_v47 = vpack.c.bf16 %v1503_v46, %v1501_v45  ;;  %v1505_v50 = vpop.eup %1504 }
 0x343   : > { %v1507_v51 = vpop.eup %1506  ;;  %v634_v57 = vmul.f32 %v1505_v50, %v632_v55  ;;  %v938_v55 = vld [vmem:[#allocation2] sm:$0xff] (!%p1205_p2) }
 0x344   : > { %1298 = vmatmul.mubr.bf16.vlgmr.msra.gmra.mrb[0].mxu1 %v658_v47  ;;  %v633_v53 = vmul.f32 %v1507_v51, %v631_v52  ;;  %940 = vst.msk [vmem:[%s2297_s24] sm:$0xff] (!%p1205_p2), %vm641_vm4, %v938_v55 }
 0x345   : > { %1321 = vmatprep.mubr.msk.bf16.mxu1 (!%p1205_p2), %vm1884_vm5, %v1883_v11  ;;  %1314 = vmatpush3.bf16.xpose.msra.mxu1 (!%p1205_p2), %v873_v22 }
 0x346   : > { %1315 = vmatprep.subr.bf16.mxu1 (!%p1205_p2), %v1883_v11 }
 0x34d   : > { %1316 = vmatpush3.bf16.xpose.msra.mxu1 (!%p1205_p2), %v876_v32 }
 0x34e   : > { %1317 = vmatprep.subr.bf16.mxu1 (!%p1205_p2), %v1883_v11 }
 0x353   : > { %653 = vperm.xlu1 %1490, %v1505_v50  }
 0x354   : > { %648 = vperm.xlu0 %1489, %v1507_v51  }
 0x355   : > { %1318 = vmatpush3.bf16.xpose.msra.mxu1 (!%p1205_p2), %v879_v34 }
 0x356   : > { %1319 = vmatprep.subr.bf16.mxu1 (!%p1205_p2), %v1883_v11 }
 0x358   : > { %1508 = vset.pattern.permute.xlu0 (!%p1205_p2), %v1882_v10 }
 0x35d   : > { %1320 = vmatpush3.bf16.xpose.msra.mxu1 (!%p1205_p2), %v882_v36 }
 0x3cb   : > { %v636_v54 = vpop.xlane.xlu0 %635 }
 0x3cc   : > { %v639_v56 = vadd.f32 %v636_v54, %v633_v53 }
 0x3ce   : > { %642 = vst.msk [vmem:[#allocation3] sm:$0xff] %vm641_vm4, %v639_v56  ;;  %v939_v56 = vld [vmem:[#allocation2 + $0x8] sm:$0xff] (!%p1205_p2) }
 0x3cf   : > { %v638_v58 = vpop.xlane.xlu1 %637  ;;  %941 = vst.msk [vmem:[%s2297_s24 + $0x8] sm:$0xff] (!%p1205_p2), %vm641_vm4, %v939_v56 }
 0x3d0   : > { %v640_v59 = vadd.f32 %v638_v58, %v634_v57 }
 0x3d2   : > { %643 = vst.msk [vmem:[#allocation3 + $0x8] sm:$0xff] %vm641_vm4, %v640_v59 }
 0x3d3   : > { %v649_v61 = vpop.permute.xlu0 %648  ;;  %v654_v63 = vpop.permute.xlu1 %653 }
 0x3d4   : > { %v656_v0 = vmul.f32 %v649_v61, %v644_v60  ;;  %v657_v2 = vmul.f32 %v654_v63, %v645_v62 }
 0x3d5   : > { %v718_v8 = vld [vmem:[#allocation3] sm:$0xff] (!%p1205_p2) }
 0x3d6   : > { %1517 = vrcp.f32 (!%p1205_p2), %v718_v8 }
 0x3d9   : > { %v719_v9 = vld [vmem:[#allocation3 + $0x8] sm:$0xff] (!%p1205_p2) }
 0x3da   : > { %1519 = vrcp.f32 (!%p1205_p2), %v719_v9 }
 0x3e0   : > { %v1518_v16 = vpop.eup (!%p1205_p2), %1517 }
 0x3e1   : > { %728 = vperm.xlu0 (!%p1205_p2), %1508, %v1518_v16  }
 0x3e4   : > { %v1520_v17 = vpop.eup (!%p1205_p2), %1519 }
 0x3e5   : > { %733 = vperm.xlu0 (!%p1205_p2), %1508, %v1520_v17  }
 0x416   : > { %717 = sbr.rel (%p1205_p2) target bundleno = 1583 (0x62f), region = 76 }
 0x417   : > { %v701_v1 = vpop.f32.mrb[0].mxu1 }
 0x418   : > { %v708_v3 = vadd.f32 %v701_v1, %v656_v0  ;;  %v1299_v4 = vpop.f32.mrb[1].mxu1 }
 0x419   : > { %v704_v5 = vpop.f32.mrb[2].mxu1 }
 0x41a   : > { %710 = vst.msk [vmem:[#allocation4] sm:$0xff] %vm532_vm2, %v708_v3  ;;  %v709_v6 = vadd.f32 %v704_v5, %v657_v2  ;;  %v1300_v7 = vpop.f32.mrb[3].mxu1 }
 0x41c   : > { %711 = vst.msk [vmem:[#allocation4 + $0x8] sm:$0xff] %vm532_vm2, %v709_v6 }
 0x421   : > { %v724_v25 = vld [vmem:[#allocation4] sm:$0xff] }
 0x423   : > { %v725_v26 = vld [vmem:[#allocation4 + $0x8] sm:$0xff] }
 0x460   : > { %v729_v24 = vpop.permute.xlu0 %728 }
 0x461   : > { %v736_v28 = vmul.f32 %v729_v24, %v724_v25 }
 0x464   : > { %v734_v27 = vpop.permute.xlu0 %733 }
 0x465   : > { %v737_v29 = vmul.f32 %v734_v27, %v725_v26 }
 0x467   : > { %v738_v30 = vpack.c.bf16 %v737_v29, %v736_v28 }
 0x469   : > { %1310 = vmatmul.mubr.msk.bf16.vlgmr.msra.gmra.mrb[0].mxu0 %vm532_vm2, %v738_v30 }
 0x53c   : > { %v823_v38 = vpop.f32.mrb[0].mxu0 }
 0x53d   : > { %v824_v39 = vadd.f32 %v1206_v37, %v823_v38  ;;  %v1311_v40 = vpop.f32.mrb[1].mxu0 }
 0x53e   : > { %v826_v41 = vpop.f32.mrb[2].mxu0 }
 0x53f   : > { %v832_v42 = vmul.f32 0.70710677, %v824_v39  ;;  %v827_v43 = vadd.f32 %v1206_v37, %v826_v41  ;;  %v1312_v44 = vpop.f32.mrb[3].mxu0  ;;  %v830_v49 = vmul.f32 0.5, %v824_v39 }
 0x541   : > { %1521 = verf.f32 %v832_v42  ;;  %v833_v45 = vmul.f32 0.70710677, %v827_v43  ;;  %v831_v50 = vmul.f32 0.5, %v827_v43 }
 0x543   : > { %1523 = verf.f32 %v833_v45 }
 0x54b   : > { %v1522_v46 = vpop.eup %1521 }
 0x54c   : > { %v836_v47 = vadd.f32 1.0, %v1522_v46 }
 0x54d   : > { %v1524_v48 = vpop.eup %1523 }
 0x54e   : > { %v837_v51 = vadd.f32 1.0, %v1524_v48  ;;  %v838_v52 = vmul.f32 %v836_v47, %v830_v49 }
 0x550   : > { %v839_v53 = vmul.f32 %v837_v51, %v831_v50 }
 0x552   : > { %v840_v54 = vpack.c.bf16 %v839_v53, %v838_v52 }
 0x554   : > { %1322 = vmatmul.mubr.msk.bf16.vlgmr.msra.gmra.mrb[0].mxu1 %vm532_vm2, %v840_v54 }
 0x627   : > { %v918_v57 = vpop.f32.mrb[0].mxu1 }
 0x628   : > { %v925_v58 = vmul.f32 %v918_v57, %v729_v24  ;;  %v1323_v59 = vpop.f32.mrb[1].mxu1 }
 0x629   : > { %v921_v60 = vpop.f32.mrb[2].mxu1 }
 0x62a   : > { %v1229_v61 = vpack.c.bf16 %v925_v58, %v925_v58  ;;  %v926_v62 = vmul.f32 %v921_v60, %v734_v27  ;;  %v1324_v63 = vpop.f32.mrb[3].mxu1 }
 0x62c   : > { %936 = vst.msk [vmem:[%s2295_s4] sm:$0xf] %vm935_vm6, %v1229_v61  ;;  %v1230_v0 = vpack.c.bf16 %v926_v62, %v926_v62 }
 0x62e   : > { %937 = vst.msk [vmem:[%s2295_s4 + $0x4] sm:$0xf] %vm935_vm6, %v1230_v0 }
 0x62f PF: > { %s2543_s3 = sld [smem:[#allocation29_spill]]  ;;  %s2544_s16 = sld [smem:[#allocation35_spill]] }
 0x630   : > { %s2545_s13 = sld [smem:[#allocation41_spill]]  ;;  %s961_s14 = sshll.u32 %s2295_s4, 4  ;;  %s2350_s14 = int_to_ptr.vmem [resolvable:$true] %s961_s14 }
 0x631   : > { %s943_s21 = scalar_lea.sflag [#allocation7], %s2275_s30  ;;  %s1699_s22 = scalar_lea.vmem %s2350_s14, 128 }
 0x632   : > { %p1700_p7 = scmp.ne.s32.totalorder %s2350_s14, %s1699_s22  ;;  %s1885_s28 = smov [#allocation16]  }
 0x633   : > { %s1703_s23 = sshll.u32 %s1885_s28, 4  ;;  %s1704_s23 = int_to_ptr.vmem [resolvable:$false] %s1703_s23 }
 0x634   : > { %s1705_s17 = scalar_lea.vmem %s1704_s23, 256  ;;  %p1706_p9 = scmp.lt.s32.totalorder %s2350_s14, %s1704_s23 }
 0x635   : > { %s1231_s6 = sshll.u32 %s2543_s3, 7  ;;  %p2546_p13 = scmp.ne.s32.totalorder %s2544_s16, 0 }
 0x636   : > { %s2347_s7 = scalar_lea.hbm %s2545_s13, %s1231_s6  ;;  %p1707_p10 = scmp.lt.s32.totalorder %s1705_s17, %s1699_s22 }
 0x637   : > { %p1701_p3 = pnand %p1700_p7, %p2546_p13 }
 0x638   : > { %p1708_p5 = por %p1707_p10, %p1706_p9 }
 0x639   : > { %p1702_p12 = pneg %p1701_p3 }
 0x63b   : > { %p1709_p1 = pnand %p1708_p5, %p1702_p12 }
 0x63d   : > { %1712 = shalt.err (!%p1709_p1)
}
 0x63e   : > { %s1713_s19 = scalar_lea.hbm %s2347_s7, 128  ;;  %s1717_s27 = scalar_lea.hbm %s2545_s13, 256 }
 0x63f   : > { %p1714_p6 = scmp.ne.s32.totalorder %s2347_s7, %s1713_s19  ;;  %p1718_p11 = scmp.lt.u32.totalorder %s2347_s7, %s2545_s13 }
 0x640   : > { %p1719_p4 = scmp.lt.u32.totalorder %s1717_s27, %s1713_s19  ;;  %p1721_p7 = scmp.lt.u32.totalorder %s1713_s19, %s2347_s7 }
 0x641   : > { %p1715_p8 = pnand %p1714_p6, %p2546_p13 }
 0x642   : > { %p1720_p2 = por %p1719_p4, %p1718_p11 }
 0x643   : > { %p1716_p0 = pneg %p1715_p8 }
 0x644   : > { %p1722_p3 = por %p1721_p7, %p1720_p2 }
 0x646   : > { %p1723_p12 = pnand %p1722_p3, %p1716_p0 }
 0x648   : > { %1726 = shalt.err (!%p1723_p12)
}
 0x649   : > { %s1886_s12 = smov 64   ;;  %s1887_s6 = smov 4  }
 0x64a   : > { %1343 = dma.vmem_to_hbm [thread:$0]  (%p2546_p13), %s2350_s14, 128, %s2347_s7, %s943_s21, %s1886_s12, %s1886_s12, %s1887_s6  }
 0x64b   : > { %s1232_s25 = sshll.u32 %s2543_s3, 8  ;;  %s977_s1 = sshll.u32 %s2297_s24, 4  ;;  %s2383_s1 = int_to_ptr.vmem [resolvable:$true] %s977_s1 }
 0x64c   : > { %s2547_s23 = sld [smem:[#allocation42_spill]]  ;;  %s948_s19 = scalar_lea.sflag [#allocation18], %s2275_s30 }
 0x64d   : > { %s1727_s5 = scalar_lea.vmem %s2383_s1, 256  ;;  %s1888_s15 = smov [#allocation17]  }
 0x64e   : > { %p1728_p9 = scmp.ne.s32.totalorder %s2383_s1, %s1727_s5  ;;  %s1731_s7 = sshll.u32 %s1888_s15, 4  ;;  %s1732_s7 = int_to_ptr.vmem [resolvable:$false] %s1731_s7 }
 0x64f   : > { %s1733_s24 = scalar_lea.vmem %s1732_s7, 512  ;;  %p1734_p1 = scmp.lt.s32.totalorder %s2383_s1, %s1732_s7 }
 0x650   : > { %p1729_p10 = pnand %p1728_p9, %p2546_p13  ;;  %p1735_p6 = scmp.lt.s32.totalorder %s1733_s24, %s1727_s5 }
 0x652   : > { %s2381_s17 = scalar_lea.hbm %s2547_s23, %s1232_s25  ;;  %p1730_p5 = pneg %p1729_p10 }
 0x653   : > { %p1736_p8 = por %p1735_p6, %p1734_p1 }
 0x655   : > { %p1737_p0 = pnand %p1736_p8, %p1730_p5 }
 0x657   : > { %1740 = shalt.err (!%p1737_p0)
}
 0x658   : > { %s1741_s3 = scalar_lea.hbm %s2381_s17, 256  ;;  %s1745_s27 = scalar_lea.hbm %s2547_s23, 512 }
 0x659   : > { %p1742_p11 = scmp.ne.s32.totalorder %s2381_s17, %s1741_s3  ;;  %p1746_p7 = scmp.lt.u32.totalorder %s2381_s17, %s2547_s23 }
 0x65a   : > { %p1747_p3 = scmp.lt.u32.totalorder %s1745_s27, %s1741_s3  ;;  %p1749_p9 = scmp.lt.u32.totalorder %s1741_s3, %s2381_s17 }
 0x65b   : > { %p1743_p4 = pnand %p1742_p11, %p2546_p13 }
 0x65c   : > { %p1748_p12 = por %p1747_p3, %p1746_p7 }
 0x65d   : > { %p1744_p2 = pneg %p1743_p4 }
 0x65e   : > { %p1750_p10 = por %p1749_p9, %p1748_p12 }
 0x660   : > { %p1751_p5 = pnand %p1750_p10, %p1744_p2 }
 0x662   : > { %1754 = shalt.err (!%p1751_p5)
}
 0x663   : > { %s1889_s12 = smov 128   ;;  %s1890_s6 = smov 8  }
 0x664   : > { %1344 = dma.vmem_to_hbm [thread:$0]  (%p2546_p13), %s2383_s1, 256, %s2381_s17, %s948_s19, %s1889_s12, %s1889_s12, %s1890_s6  }
 0x665 PF: > { %s2548_s25 = sld [smem:[#allocation25_spill]]  ;;  %s2549_s22 = sld [smem:[#allocation34_spill]] }
 0x666   : > { %p1381_p1 = scmp.ge.s32.totalorder %s1865_s11, 2 }
 0x66b   : > { %s992_s28 = sand.u32 1, %s2548_s25   ;;  %p2550_p6 = scmp.ne.s32.totalorder %s2549_s22, 0 }
 0x66c   : > { %s993_s5 = scalar_lea.sflag [#allocation7], %s992_s28 }
 0x66d   : > { %p1368_p8 = pnand %p1381_p1, %p2550_p6 }
 0x66f   : > { %1816 = dma.done.wait (!%p1368_p8), %s993_s5, 128  }
 0x670   : > { %1818 = vsyncadd (!%p1368_p8), %s993_s5, 4294967168  ;;  %s1002_s15 = scalar_lea.sflag [#allocation18], %s992_s28 }
 0x671   : > { %1820 = dma.done.wait (!%p1368_p8), %s1002_s15, 256  }
 0x672   : > { %1822 = vsyncadd (!%p1368_p8), %s1002_s15, 4294967040  ;;  %s32_s11 = sadd.s32 1, %s1865_s11   ;;  %s2551_s24 = sld [smem:[#allocation26_spill]] }
 0x673   : > { %p29_p0 = scmp.ge.s32.totalorder %s32_s11, 6   ;;  %s2552_s27 = sld [smem:[#allocation27_spill]] }
 0x674   : > { %s2553_s30 = sld [smem:[#allocation30_spill]]  ;;  %s2554_s16 = sld [smem:[#allocation36_spill]] }
 0x675   : > { %s2555_s25 = smov %s1833_s26  ;;  %s2556_s26 = smov %s2185_s20 }
 0x676   : > { %s2557_s28 = smov %s1845_s29  ;;  %s2558_s29 = smov %s2188_s9 }
 0x677   : > { %s2559_s8 = smov %s1861_s10  ;;  %s2561_s10 = smov %s2567_s18 }
 0x678   :  { %31 = sbr.rel (!%p29_p0) target bundleno = 22 (0x16), region = 150 }
 0x67a   : > { %s2560_s9 = smov %s2554_s16 }
 0x67f   :  { %1007 = vsyncpa [#allocation6], 1 }
 0x680   :  { %1009 = vsyncpa [#allocation6 + $0x1], 1 }
 0x681   :  { %1010 = vsyncpa [#allocation9], 1 }
 0x682   :  { %1012 = vsyncpa [#allocation9 + $0x1], 1 }
 0x683   :  { %1013 = vsyncpa [#allocation12], 1 }
 0x684   :  { %1014 = vsyncpa [#allocation15], 1 }
 0x685   :  { %1015 = vsyncpa [#allocation7], 1 }
 0x686   :  { %1017 = vsyncpa [#allocation7 + $0x1], 1 }
 0x687   :  { %1018 = vsyncpa [#allocation18], 1 }
 0x688   :  { %1020 = vsyncpa [#allocation18 + $0x1], 1 }

</bundles_post_ra>
